<compile_context>
chip_gen: v7x
topology: tpu7x:2x2x1
jax: 0.10.0
libtpu: 0.0.40
codegen_flags: <defaults>
</compile_context>

<pallas_src>
import functools
from dataclasses import dataclass

import jax
import jax.numpy as jnp
from jax.experimental import pallas as pl
from jax.experimental.pallas import tpu as pltpu


@dataclass
class ModelArgs:
    block_size: int = 8
    vocab_size: int = 128
    n_layer: int = 2
    n_head: int = 2
    n_embd: int = 32
    dropout: float = 0.0
    bias: bool = True
    flash: bool = False
    transformer_active_func: str = "ReLU"
    norm_layer: str = "BatchNorm"
    single_output: bool = False
    use_weight_tying: bool = True
    custom_ln: bool = False
    use_causal: bool = False
    shift_targets: bool = False
    pos_layer: str = "learned"


# ----------------------------- kernel ----------------------------------------


def _layernorm(x, g, b, eps=1e-5):
    mu = jnp.mean(x, axis=-1, keepdims=True)
    var = jnp.mean((x - mu) ** 2, axis=-1, keepdims=True)
    return (x - mu) * jax.lax.rsqrt(var + eps) * g + b


def fused_forward_kernel(
    x_ref,
    ln1g_ref, ln1b_ref,
    wq_ref, bq_ref, wk_ref, bk_ref, wv_ref, bv_ref,
    wo_ref, bo_ref,
    ln2g_ref, ln2b_ref,
    wfc_ref, bfc_ref, wpr_ref, bpr_ref,
    lnfg_ref, lnfb_ref, wte_t_ref,
    o_ref,
    *, n_layer, n_head, single_output,
):
    # One batch element per grid step; everything below stays VMEM-resident.
    x = x_ref[0]                               # (T, D) float32
    T, D = x.shape
    hd = D // n_head
    scale = 1.0 / (hd ** 0.5)
    bf16 = jnp.bfloat16
    f32 = jnp.float32

    for l in range(n_layer):                   # static unroll over layers
        # ---- attention (pre-norm, non-causal, dropout = 0.0) ----
        h = _layernorm(x, ln1g_ref[l], ln1b_ref[l]).astype(bf16)
        q = jnp.dot(h, wq_ref[l], preferred_element_type=f32) + bq_ref[l]
        k = jnp.dot(h, wk_ref[l], preferred_element_type=f32) + bk_ref[l]
        v = jnp.dot(h, wv_ref[l], preferred_element_type=f32) + bv_ref[l]
        q = q * scale                          # fold 1/sqrt(hd) once per layer

        head_outs = []
        for hh in range(n_head):               # static unroll over heads
            lo = hh * hd
            qh = q[:, lo:lo + hd].astype(bf16)
            kh = k[:, lo:lo + hd].astype(bf16)
            vh = v[:, lo:lo + hd].astype(bf16)
            s = jnp.einsum("qd,kd->qk", qh, kh,
                           preferred_element_type=f32)
            s = s - jnp.max(s, axis=-1, keepdims=True)
            p = jnp.exp(s)
            p = p * pl.reciprocal(jnp.sum(p, axis=-1, keepdims=True),
                                  approx=True)
            head_outs.append(jnp.dot(p.astype(bf16), vh,
                                     preferred_element_type=f32))
        # single concat-heads @ Wo matmul (K = D), no per-head accumulation
        ctx = jnp.concatenate(head_outs, axis=-1).astype(bf16)      # (T, D)
        attn = jnp.dot(ctx, wo_ref[l], preferred_element_type=f32) + bo_ref[l]
        x = x + attn                            # residual

        # ---- MLP (pre-norm, ReLU per transformer_active_func) ----
        h2 = _layernorm(x, ln2g_ref[l], ln2b_ref[l]).astype(bf16)
        m = jnp.dot(h2, wfc_ref[l], preferred_element_type=f32) + bfc_ref[l]
        m = jnp.maximum(m, 0.0).astype(bf16)
        y = jnp.dot(m, wpr_ref[l], preferred_element_type=f32) + bpr_ref[l]
        x = x + y                               # residual

    # ---- final norm + weight-tied LM head (lane-dense: wte pre-transposed) ---
    if single_output:
        x = x[T - 1:T, :]
    hf = _layernorm(x, lnfg_ref[...], lnfb_ref[...]).astype(bf16)
    o_ref[0] = jnp.dot(hf, wte_t_ref[...], preferred_element_type=f32)


# ----------------------------- wrapper ----------------------------------------


def _const_spec(a):
    nd = a.ndim
    return pl.BlockSpec(a.shape, lambda b, _nd=nd: (0,) * _nd)


def generic_model_forward(params, idx, cfg: ModelArgs):
    """idx: int32 [B, T] token ids -> logits float32 [B, T(or 1), vocab]."""
    B, T = idx.shape
    assert T <= cfg.block_size
    D, V, L = cfg.n_embd, cfg.vocab_size, cfg.n_layer
    assert D % cfg.n_head == 0
    bf16 = jnp.bfloat16

    # embedding gathers are glue (plain JAX); the hot path is one fused kernel.
    x = params["wte"][idx] + params["wpe"][jnp.arange(T)][None, :, :]

    blocks = params["blocks"]

    def stack(name, dtype=None):
        a = jnp.stack([blk[name] for blk in blocks])
        return a.astype(dtype) if dtype is not None else a

    weight_args = [
        stack("ln1_g"), stack("ln1_b"),
        stack("w_q", bf16), stack("b_q"),
        stack("w_k", bf16), stack("b_k"),
        stack("w_v", bf16), stack("b_v"),
        stack("w_o", bf16), stack("b_o"),
        stack("ln2_g"), stack("ln2_b"),
        stack("w_fc", bf16), stack("b_fc"),
        stack("w_pr", bf16), stack("b_pr"),
        params["ln_f_g"], params["ln_f_b"],
        params["wte"].T.astype(bf16),           # (D, V): lane-dense LM head
    ]

    To = 1 if cfg.single_output else T
    kernel = functools.partial(
        fused_forward_kernel,
        n_layer=L, n_head=cfg.n_head, single_output=cfg.single_output)

    logits = pl.pallas_call(
        kernel,
        out_shape=jax.ShapeDtypeStruct((B, To, V), jnp.float32),
        grid=(B,),
        in_specs=[pl.BlockSpec((1, T, D), lambda b: (b, 0, 0))]
                 + [_const_spec(a) for a in weight_args],
        out_specs=pl.BlockSpec((1, To, V), lambda b: (b, 0, 0)),
        compiler_params=pltpu.CompilerParams(
            dimension_semantics=("parallel",)),
    )(x, *weight_args)
    return logits


# ----------------------------- params -----------------------------------------


def init_params(key, cfg: ModelArgs):
    D, V = cfg.n_embd, cfg.vocab_size
    keys = jax.random.split(key, 2 + 6 * cfg.n_layer)
    ki = iter(keys)
    p = {
        "wte": 0.02 * jax.random.normal(next(ki), (V, D), jnp.float32),
        "wpe": 0.02 * jax.random.normal(next(ki), (cfg.block_size, D),
                                        jnp.float32),
        "ln_f_g": jnp.ones((1, D), jnp.float32),
        "ln_f_b": jnp.zeros((1, D), jnp.float32),
        "blocks": [],
    }
    for _ in range(cfg.n_layer):
        blk = {
            "ln1_g": jnp.ones((1, D), jnp.float32),
            "ln1_b": jnp.zeros((1, D), jnp.float32),
            "w_q": 0.02 * jax.random.normal(next(ki), (D, D), jnp.float32),
            "b_q": jnp.zeros((1, D), jnp.float32),
            "w_k": 0.02 * jax.random.normal(next(ki), (D, D), jnp.float32),
            "b_k": jnp.zeros((1, D), jnp.float32),
            "w_v": 0.02 * jax.random.normal(next(ki), (D, D), jnp.float32),
            "b_v": jnp.zeros((1, D), jnp.float32),
            "w_o": 0.02 * jax.random.normal(next(ki), (D, D), jnp.float32),
            "b_o": jnp.zeros((1, D), jnp.float32),
            "ln2_g": jnp.ones((1, D), jnp.float32),
            "ln2_b": jnp.zeros((1, D), jnp.float32),
            "w_fc": 0.02 * jax.random.normal(next(ki), (D, 4 * D), jnp.float32),
            "b_fc": jnp.zeros((1, 4 * D), jnp.float32),
            "w_pr": 0.02 * jax.random.normal(next(ki), (4 * D, D), jnp.float32),
            "b_pr": jnp.zeros((1, D), jnp.float32),
        }
        p["blocks"].append(blk)
    return p


if __name__ == "__main__":
    cfg = ModelArgs(block_size=8, vocab_size=128, n_layer=2, n_head=2,
                    n_embd=32)
    key = jax.random.PRNGKey(0)
    pkey, ikey = jax.random.split(key)
    params = init_params(pkey, cfg)

    B, T = 2, 8
    idx = jax.random.randint(ikey, (B, T), 0, cfg.vocab_size, dtype=jnp.int32)

    fwd = jax.jit(functools.partial(generic_model_forward, cfg=cfg))
    logits = fwd(params, idx)
    jax.block_until_ready(logits)
    assert logits.shape == (B, T, cfg.vocab_size)
    assert bool(jnp.all(jnp.isfinite(logits)))
    print("KERNEL_OK")
</pallas_src>

<mosaic_0001>
module attributes {stable_mosaic.version = 11 : i64} {
  func.func @fused_forward_kernel(%arg0: i32, %arg1: memref<1x8x32xf32, #tpu.memory_space<vmem>>, %arg2: memref<2x1x32xf32, #tpu.memory_space<vmem>>, %arg3: memref<2x1x32xf32, #tpu.memory_space<vmem>>, %arg4: memref<2x32x32xbf16, #tpu.memory_space<vmem>>, %arg5: memref<2x1x32xf32, #tpu.memory_space<vmem>>, %arg6: memref<2x32x32xbf16, #tpu.memory_space<vmem>>, %arg7: memref<2x1x32xf32, #tpu.memory_space<vmem>>, %arg8: memref<2x32x32xbf16, #tpu.memory_space<vmem>>, %arg9: memref<2x1x32xf32, #tpu.memory_space<vmem>>, %arg10: memref<2x32x32xbf16, #tpu.memory_space<vmem>>, %arg11: memref<2x1x32xf32, #tpu.memory_space<vmem>>, %arg12: memref<2x1x32xf32, #tpu.memory_space<vmem>>, %arg13: memref<2x1x32xf32, #tpu.memory_space<vmem>>, %arg14: memref<2x32x128xbf16, #tpu.memory_space<vmem>>, %arg15: memref<2x1x128xf32, #tpu.memory_space<vmem>>, %arg16: memref<2x128x32xbf16, #tpu.memory_space<vmem>>, %arg17: memref<2x1x32xf32, #tpu.memory_space<vmem>>, %arg18: memref<1x32xf32, #tpu.memory_space<vmem>>, %arg19: memref<1x32xf32, #tpu.memory_space<vmem>>, %arg20: memref<32x128xbf16, #tpu.memory_space<vmem>>, %arg21: memref<1x8x128xf32, #tpu.memory_space<vmem>>) attributes {dimension_semantics = [#tpu.dimension_semantics<parallel>], iteration_bounds = array<i64: 2>, scalar_prefetch = 0 : i64, scratch_operands = 0 : i64, tpu.core_type = #tpu.core_type<tc>, window_params = [{transform_indices = @transform_0, window_bounds = array<i64: 1, 8, 32>}, {pipeline_mode = #tpu.pipeline_mode<synchronous>, transform_indices = @transform_1, window_bounds = array<i64: 2, 1, 32>}, {pipeline_mode = #tpu.pipeline_mode<synchronous>, transform_indices = @transform_2, window_bounds = array<i64: 2, 1, 32>}, {pipeline_mode = #tpu.pipeline_mode<synchronous>, transform_indices = @transform_3, window_bounds = array<i64: 2, 32, 32>}, {pipeline_mode = #tpu.pipeline_mode<synchronous>, transform_indices = @transform_4, window_bounds = array<i64: 2, 1, 32>}, {pipeline_mode = #tpu.pipeline_mode<synchronous>, transform_indices = @transform_5, window_bounds = array<i64: 2, 32, 32>}, {pipeline_mode = #tpu.pipeline_mode<synchronous>, transform_indices = @transform_6, window_bounds = array<i64: 2, 1, 32>}, {pipeline_mode = #tpu.pipeline_mode<synchronous>, transform_indices = @transform_7, window_bounds = array<i64: 2, 32, 32>}, {pipeline_mode = #tpu.pipeline_mode<synchronous>, transform_indices = @transform_8, window_bounds = array<i64: 2, 1, 32>}, {pipeline_mode = #tpu.pipeline_mode<synchronous>, transform_indices = @transform_9, window_bounds = array<i64: 2, 32, 32>}, {pipeline_mode = #tpu.pipeline_mode<synchronous>, transform_indices = @transform_10, window_bounds = array<i64: 2, 1, 32>}, {pipeline_mode = #tpu.pipeline_mode<synchronous>, transform_indices = @transform_11, window_bounds = array<i64: 2, 1, 32>}, {pipeline_mode = #tpu.pipeline_mode<synchronous>, transform_indices = @transform_12, window_bounds = array<i64: 2, 1, 32>}, {pipeline_mode = #tpu.pipeline_mode<synchronous>, transform_indices = @transform_13, window_bounds = array<i64: 2, 32, 128>}, {pipeline_mode = #tpu.pipeline_mode<synchronous>, transform_indices = @transform_14, window_bounds = array<i64: 2, 1, 128>}, {pipeline_mode = #tpu.pipeline_mode<synchronous>, transform_indices = @transform_15, window_bounds = array<i64: 2, 128, 32>}, {pipeline_mode = #tpu.pipeline_mode<synchronous>, transform_indices = @transform_16, window_bounds = array<i64: 2, 1, 32>}, {pipeline_mode = #tpu.pipeline_mode<synchronous>, transform_indices = @transform_17, window_bounds = array<i64: 1, 32>}, {pipeline_mode = #tpu.pipeline_mode<synchronous>, transform_indices = @transform_18, window_bounds = array<i64: 1, 32>}, {pipeline_mode = #tpu.pipeline_mode<synchronous>, transform_indices = @transform_19, window_bounds = array<i64: 32, 128>}, {transform_indices = @transform_20, window_bounds = array<i64: 1, 8, 128>}]} {
    %c0 = arith.constant 0 : index
    %c0_0 = arith.constant 0 : index
    %c0_1 = arith.constant 0 : index
    %0 = vector.load %arg1[%c0, %c0_0, %c0_1] : memref<1x8x32xf32, #tpu.memory_space<vmem>>, vector<1x8x32xf32>
    %1 = vector.shape_cast %0 : vector<1x8x32xf32> to vector<8x32xf32>
    %c0_2 = arith.constant 0 : index
    %c0_3 = arith.constant 0 : index
    %c0_4 = arith.constant 0 : index
    %2 = vector.load %arg2[%c0_2, %c0_3, %c0_4] : memref<2x1x32xf32, #tpu.memory_space<vmem>>, vector<1x1x32xf32>
    %3 = vector.shape_cast %2 : vector<1x1x32xf32> to vector<1x32xf32>
    %c0_5 = arith.constant 0 : index
    %c0_6 = arith.constant 0 : index
    %c0_7 = arith.constant 0 : index
    %4 = vector.load %arg3[%c0_5, %c0_6, %c0_7] : memref<2x1x32xf32, #tpu.memory_space<vmem>>, vector<1x1x32xf32>
    %5 = vector.shape_cast %4 : vector<1x1x32xf32> to vector<1x32xf32>
    %cst = arith.constant dense<0.000000e+00> : vector<8xf32>
    %6 = vector.multi_reduction <add>, %1, %cst [1] : vector<8x32xf32> to vector<8xf32>
    %7 = vector.shape_cast %6 : vector<8xf32> to vector<8x1xf32>
    %cst_8 = arith.constant 3.200000e+01 : f32
    %8 = vector.broadcast %cst_8 : f32 to vector<8x1xf32>
    %9 = arith.divf %7, %8 : vector<8x1xf32>
    %10 = vector.broadcast %9 : vector<8x1xf32> to vector<8x32xf32>
    %11 = arith.subf %1, %10 : vector<8x32xf32>
    %12 = arith.mulf %11, %11 : vector<8x32xf32>
    %cst_9 = arith.constant dense<0.000000e+00> : vector<8xf32>
    %13 = vector.multi_reduction <add>, %12, %cst_9 [1] : vector<8x32xf32> to vector<8xf32>
    %14 = vector.shape_cast %13 : vector<8xf32> to vector<8x1xf32>
    %cst_10 = arith.constant 3.200000e+01 : f32
    %15 = vector.broadcast %cst_10 : f32 to vector<8x1xf32>
    %16 = arith.divf %14, %15 : vector<8x1xf32>
    %17 = vector.broadcast %9 : vector<8x1xf32> to vector<8x32xf32>
    %18 = arith.subf %1, %17 : vector<8x32xf32>
    %cst_11 = arith.constant 9.99999974E-6 : f32
    %19 = vector.broadcast %cst_11 : f32 to vector<8x1xf32>
    %20 = arith.addf %16, %19 : vector<8x1xf32>
    %21 = math.rsqrt %20 : vector<8x1xf32>
    %22 = vector.broadcast %21 : vector<8x1xf32> to vector<8x32xf32>
    %23 = arith.mulf %18, %22 : vector<8x32xf32>
    %24 = vector.broadcast %3 : vector<1x32xf32> to vector<8x32xf32>
    %25 = arith.mulf %23, %24 : vector<8x32xf32>
    %26 = vector.broadcast %5 : vector<1x32xf32> to vector<8x32xf32>
    %27 = arith.addf %25, %26 : vector<8x32xf32>
    %28 = arith.truncf %27 : vector<8x32xf32> to vector<8x32xbf16>
    %c0_12 = arith.constant 0 : index
    %c0_13 = arith.constant 0 : index
    %c0_14 = arith.constant 0 : index
    %29 = vector.load %arg4[%c0_12, %c0_13, %c0_14] : memref<2x32x32xbf16, #tpu.memory_space<vmem>>, vector<1x32x32xbf16>
    %30 = vector.shape_cast %29 : vector<1x32x32xbf16> to vector<32x32xbf16>
    %cst_15 = arith.constant dense<0.000000e+00> : vector<8x32xf32>
    %31 = tpu.matmul %28, %30, %cst_15 {dimension_numbers = #tpu.dot_dimension_numbers<[1], [0], [0], [1], [0, 0, 1, 1], [], []>} : vector<8x32xbf16>, vector<32x32xbf16>, vector<8x32xf32> -> vector<8x32xf32>
    %c0_16 = arith.constant 0 : index
    %c0_17 = arith.constant 0 : index
    %c0_18 = arith.constant 0 : index
    %32 = vector.load %arg5[%c0_16, %c0_17, %c0_18] : memref<2x1x32xf32, #tpu.memory_space<vmem>>, vector<1x1x32xf32>
    %33 = vector.shape_cast %32 : vector<1x1x32xf32> to vector<1x32xf32>
    %34 = vector.broadcast %33 : vector<1x32xf32> to vector<8x32xf32>
    %35 = arith.addf %31, %34 : vector<8x32xf32>
    %c0_19 = arith.constant 0 : index
    %c0_20 = arith.constant 0 : index
    %c0_21 = arith.constant 0 : index
    %36 = vector.load %arg6[%c0_19, %c0_20, %c0_21] : memref<2x32x32xbf16, #tpu.memory_space<vmem>>, vector<1x32x32xbf16>
    %37 = vector.shape_cast %36 : vector<1x32x32xbf16> to vector<32x32xbf16>
    %cst_22 = arith.constant dense<0.000000e+00> : vector<8x32xf32>
    %38 = tpu.matmul %28, %37, %cst_22 {dimension_numbers = #tpu.dot_dimension_numbers<[1], [0], [0], [1], [0, 0, 1, 1], [], []>} : vector<8x32xbf16>, vector<32x32xbf16>, vector<8x32xf32> -> vector<8x32xf32>
    %c0_23 = arith.constant 0 : index
    %c0_24 = arith.constant 0 : index
    %c0_25 = arith.constant 0 : index
    %39 = vector.load %arg7[%c0_23, %c0_24, %c0_25] : memref<2x1x32xf32, #tpu.memory_space<vmem>>, vector<1x1x32xf32>
    %40 = vector.shape_cast %39 : vector<1x1x32xf32> to vector<1x32xf32>
    %41 = vector.broadcast %40 : vector<1x32xf32> to vector<8x32xf32>
    %42 = arith.addf %38, %41 : vector<8x32xf32>
    %c0_26 = arith.constant 0 : index
    %c0_27 = arith.constant 0 : index
    %c0_28 = arith.constant 0 : index
    %43 = vector.load %arg8[%c0_26, %c0_27, %c0_28] : memref<2x32x32xbf16, #tpu.memory_space<vmem>>, vector<1x32x32xbf16>
    %44 = vector.shape_cast %43 : vector<1x32x32xbf16> to vector<32x32xbf16>
    %cst_29 = arith.constant dense<0.000000e+00> : vector<8x32xf32>
    %45 = tpu.matmul %28, %44, %cst_29 {dimension_numbers = #tpu.dot_dimension_numbers<[1], [0], [0], [1], [0, 0, 1, 1], [], []>} : vector<8x32xbf16>, vector<32x32xbf16>, vector<8x32xf32> -> vector<8x32xf32>
    %c0_30 = arith.constant 0 : index
    %c0_31 = arith.constant 0 : index
    %c0_32 = arith.constant 0 : index
    %46 = vector.load %arg9[%c0_30, %c0_31, %c0_32] : memref<2x1x32xf32, #tpu.memory_space<vmem>>, vector<1x1x32xf32>
    %47 = vector.shape_cast %46 : vector<1x1x32xf32> to vector<1x32xf32>
    %48 = vector.broadcast %47 : vector<1x32xf32> to vector<8x32xf32>
    %49 = arith.addf %45, %48 : vector<8x32xf32>
    %cst_33 = arith.constant 2.500000e-01 : f32
    %50 = vector.broadcast %cst_33 : f32 to vector<8x32xf32>
    %51 = arith.mulf %35, %50 : vector<8x32xf32>
    %52 = vector.extract_strided_slice %51 {offsets = [0, 0], sizes = [8, 16], strides = [1, 1]} : vector<8x32xf32> to vector<8x16xf32>
    %53 = arith.truncf %52 : vector<8x16xf32> to vector<8x16xbf16>
    %54 = vector.extract_strided_slice %42 {offsets = [0, 0], sizes = [8, 16], strides = [1, 1]} : vector<8x32xf32> to vector<8x16xf32>
    %55 = arith.truncf %54 : vector<8x16xf32> to vector<8x16xbf16>
    %56 = vector.extract_strided_slice %49 {offsets = [0, 0], sizes = [8, 16], strides = [1, 1]} : vector<8x32xf32> to vector<8x16xf32>
    %57 = arith.truncf %56 : vector<8x16xf32> to vector<8x16xbf16>
    "tpu.trace_start"() <{level = 10 : i32, message = "qd,kd->qk"}> : () -> ()
    %cst_34 = arith.constant dense<0.000000e+00> : vector<8x8xf32>
    %58 = tpu.matmul %53, %55, %cst_34 {dimension_numbers = #tpu.dot_dimension_numbers<[1], [1], [0], [0], [0, 0, 1, 0], [], []>} : vector<8x16xbf16>, vector<8x16xbf16>, vector<8x8xf32> -> vector<8x8xf32>
    "tpu.trace_stop"() : () -> ()
    %cst_35 = arith.constant dense<0xFF800000> : vector<8xf32>
    %59 = vector.multi_reduction <maximumf>, %58, %cst_35 [1] : vector<8x8xf32> to vector<8xf32>
    %60 = vector.shape_cast %59 : vector<8xf32> to vector<8x1xf32>
    %61 = vector.broadcast %60 : vector<8x1xf32> to vector<8x8xf32>
    %62 = arith.subf %58, %61 : vector<8x8xf32>
    %63 = math.exp %62 : vector<8x8xf32>
    %cst_36 = arith.constant dense<0.000000e+00> : vector<8xf32>
    %64 = vector.multi_reduction <add>, %63, %cst_36 [1] : vector<8x8xf32> to vector<8xf32>
    %65 = vector.shape_cast %64 : vector<8xf32> to vector<8x1xf32>
    %66 = tpu.reciprocal %65 {approx = true} : vector<8x1xf32> -> vector<8x1xf32>
    %67 = vector.broadcast %66 : vector<8x1xf32> to vector<8x8xf32>
    %68 = arith.mulf %63, %67 : vector<8x8xf32>
    %69 = arith.truncf %68 : vector<8x8xf32> to vector<8x8xbf16>
    %cst_37 = arith.constant dense<0.000000e+00> : vector<8x16xf32>
    %70 = tpu.matmul %69, %57, %cst_37 {dimension_numbers = #tpu.dot_dimension_numbers<[1], [0], [0], [1], [0, 0, 1, 1], [], []>} : vector<8x8xbf16>, vector<8x16xbf16>, vector<8x16xf32> -> vector<8x16xf32>
    %71 = vector.extract_strided_slice %51 {offsets = [0, 16], sizes = [8, 16], strides = [1, 1]} : vector<8x32xf32> to vector<8x16xf32>
    %72 = arith.truncf %71 : vector<8x16xf32> to vector<8x16xbf16>
    %73 = vector.extract_strided_slice %42 {offsets = [0, 16], sizes = [8, 16], strides = [1, 1]} : vector<8x32xf32> to vector<8x16xf32>
    %74 = arith.truncf %73 : vector<8x16xf32> to vector<8x16xbf16>
    %75 = vector.extract_strided_slice %49 {offsets = [0, 16], sizes = [8, 16], strides = [1, 1]} : vector<8x32xf32> to vector<8x16xf32>
    %76 = arith.truncf %75 : vector<8x16xf32> to vector<8x16xbf16>
    "tpu.trace_start"() <{level = 10 : i32, message = "qd,kd->qk"}> : () -> ()
    %cst_38 = arith.constant dense<0.000000e+00> : vector<8x8xf32>
    %77 = tpu.matmul %72, %74, %cst_38 {dimension_numbers = #tpu.dot_dimension_numbers<[1], [1], [0], [0], [0, 0, 1, 0], [], []>} : vector<8x16xbf16>, vector<8x16xbf16>, vector<8x8xf32> -> vector<8x8xf32>
    "tpu.trace_stop"() : () -> ()
    %cst_39 = arith.constant dense<0xFF800000> : vector<8xf32>
    %78 = vector.multi_reduction <maximumf>, %77, %cst_39 [1] : vector<8x8xf32> to vector<8xf32>
    %79 = vector.shape_cast %78 : vector<8xf32> to vector<8x1xf32>
    %80 = vector.broadcast %79 : vector<8x1xf32> to vector<8x8xf32>
    %81 = arith.subf %77, %80 : vector<8x8xf32>
    %82 = math.exp %81 : vector<8x8xf32>
    %cst_40 = arith.constant dense<0.000000e+00> : vector<8xf32>
    %83 = vector.multi_reduction <add>, %82, %cst_40 [1] : vector<8x8xf32> to vector<8xf32>
    %84 = vector.shape_cast %83 : vector<8xf32> to vector<8x1xf32>
    %85 = tpu.reciprocal %84 {approx = true} : vector<8x1xf32> -> vector<8x1xf32>
    %86 = vector.broadcast %85 : vector<8x1xf32> to vector<8x8xf32>
    %87 = arith.mulf %82, %86 : vector<8x8xf32>
    %88 = arith.truncf %87 : vector<8x8xf32> to vector<8x8xbf16>
    %cst_41 = arith.constant dense<0.000000e+00> : vector<8x16xf32>
    %89 = tpu.matmul %88, %76, %cst_41 {dimension_numbers = #tpu.dot_dimension_numbers<[1], [0], [0], [1], [0, 0, 1, 1], [], []>} : vector<8x8xbf16>, vector<8x16xbf16>, vector<8x16xf32> -> vector<8x16xf32>
    %90 = tpu.concatenate %70, %89 in 1 : vector<8x16xf32>, vector<8x16xf32> -> vector<8x32xf32>
    %91 = arith.truncf %90 : vector<8x32xf32> to vector<8x32xbf16>
    %c0_42 = arith.constant 0 : index
    %c0_43 = arith.constant 0 : index
    %c0_44 = arith.constant 0 : index
    %92 = vector.load %arg10[%c0_42, %c0_43, %c0_44] : memref<2x32x32xbf16, #tpu.memory_space<vmem>>, vector<1x32x32xbf16>
    %93 = vector.shape_cast %92 : vector<1x32x32xbf16> to vector<32x32xbf16>
    %cst_45 = arith.constant dense<0.000000e+00> : vector<8x32xf32>
    %94 = tpu.matmul %91, %93, %cst_45 {dimension_numbers = #tpu.dot_dimension_numbers<[1], [0], [0], [1], [0, 0, 1, 1], [], []>} : vector<8x32xbf16>, vector<32x32xbf16>, vector<8x32xf32> -> vector<8x32xf32>
    %c0_46 = arith.constant 0 : index
    %c0_47 = arith.constant 0 : index
    %c0_48 = arith.constant 0 : index
    %95 = vector.load %arg11[%c0_46, %c0_47, %c0_48] : memref<2x1x32xf32, #tpu.memory_space<vmem>>, vector<1x1x32xf32>
    %96 = vector.shape_cast %95 : vector<1x1x32xf32> to vector<1x32xf32>
    %97 = vector.broadcast %96 : vector<1x32xf32> to vector<8x32xf32>
    %98 = arith.addf %94, %97 : vector<8x32xf32>
    %99 = arith.addf %1, %98 : vector<8x32xf32>
    %c0_49 = arith.constant 0 : index
    %c0_50 = arith.constant 0 : index
    %c0_51 = arith.constant 0 : index
    %100 = vector.load %arg12[%c0_49, %c0_50, %c0_51] : memref<2x1x32xf32, #tpu.memory_space<vmem>>, vector<1x1x32xf32>
    %101 = vector.shape_cast %100 : vector<1x1x32xf32> to vector<1x32xf32>
    %c0_52 = arith.constant 0 : index
    %c0_53 = arith.constant 0 : index
    %c0_54 = arith.constant 0 : index
    %102 = vector.load %arg13[%c0_52, %c0_53, %c0_54] : memref<2x1x32xf32, #tpu.memory_space<vmem>>, vector<1x1x32xf32>
    %103 = vector.shape_cast %102 : vector<1x1x32xf32> to vector<1x32xf32>
    %cst_55 = arith.constant dense<0.000000e+00> : vector<8xf32>
    %104 = vector.multi_reduction <add>, %99, %cst_55 [1] : vector<8x32xf32> to vector<8xf32>
    %105 = vector.shape_cast %104 : vector<8xf32> to vector<8x1xf32>
    %cst_56 = arith.constant 3.200000e+01 : f32
    %106 = vector.broadcast %cst_56 : f32 to vector<8x1xf32>
    %107 = arith.divf %105, %106 : vector<8x1xf32>
    %108 = vector.broadcast %107 : vector<8x1xf32> to vector<8x32xf32>
    %109 = arith.subf %99, %108 : vector<8x32xf32>
    %110 = arith.mulf %109, %109 : vector<8x32xf32>
    %cst_57 = arith.constant dense<0.000000e+00> : vector<8xf32>
    %111 = vector.multi_reduction <add>, %110, %cst_57 [1] : vector<8x32xf32> to vector<8xf32>
    %112 = vector.shape_cast %111 : vector<8xf32> to vector<8x1xf32>
    %cst_58 = arith.constant 3.200000e+01 : f32
    %113 = vector.broadcast %cst_58 : f32 to vector<8x1xf32>
    %114 = arith.divf %112, %113 : vector<8x1xf32>
    %115 = vector.broadcast %107 : vector<8x1xf32> to vector<8x32xf32>
    %116 = arith.subf %99, %115 : vector<8x32xf32>
    %cst_59 = arith.constant 9.99999974E-6 : f32
    %117 = vector.broadcast %cst_59 : f32 to vector<8x1xf32>
    %118 = arith.addf %114, %117 : vector<8x1xf32>
    %119 = math.rsqrt %118 : vector<8x1xf32>
    %120 = vector.broadcast %119 : vector<8x1xf32> to vector<8x32xf32>
    %121 = arith.mulf %116, %120 : vector<8x32xf32>
    %122 = vector.broadcast %101 : vector<1x32xf32> to vector<8x32xf32>
    %123 = arith.mulf %121, %122 : vector<8x32xf32>
    %124 = vector.broadcast %103 : vector<1x32xf32> to vector<8x32xf32>
    %125 = arith.addf %123, %124 : vector<8x32xf32>
    %126 = arith.truncf %125 : vector<8x32xf32> to vector<8x32xbf16>
    %c0_60 = arith.constant 0 : index
    %c0_61 = arith.constant 0 : index
    %c0_62 = arith.constant 0 : index
    %127 = vector.load %arg14[%c0_60, %c0_61, %c0_62] : memref<2x32x128xbf16, #tpu.memory_space<vmem>>, vector<1x32x128xbf16>
    %128 = vector.shape_cast %127 : vector<1x32x128xbf16> to vector<32x128xbf16>
    %cst_63 = arith.constant dense<0.000000e+00> : vector<8x128xf32>
    %129 = tpu.matmul %126, %128, %cst_63 {dimension_numbers = #tpu.dot_dimension_numbers<[1], [0], [0], [1], [0, 0, 1, 1], [], []>} : vector<8x32xbf16>, vector<32x128xbf16>, vector<8x128xf32> -> vector<8x128xf32>
    %c0_64 = arith.constant 0 : index
    %c0_65 = arith.constant 0 : index
    %c0_66 = arith.constant 0 : index
    %130 = vector.load %arg15[%c0_64, %c0_65, %c0_66] : memref<2x1x128xf32, #tpu.memory_space<vmem>>, vector<1x1x128xf32>
    %131 = vector.shape_cast %130 : vector<1x1x128xf32> to vector<1x128xf32>
    %132 = vector.broadcast %131 : vector<1x128xf32> to vector<8x128xf32>
    %133 = arith.addf %129, %132 : vector<8x128xf32>
    %cst_67 = arith.constant 0.000000e+00 : f32
    %134 = vector.broadcast %cst_67 : f32 to vector<8x128xf32>
    %135 = arith.maximumf %133, %134 : vector<8x128xf32>
    %136 = arith.truncf %135 : vector<8x128xf32> to vector<8x128xbf16>
    %c0_68 = arith.constant 0 : index
    %c0_69 = arith.constant 0 : index
    %c0_70 = arith.constant 0 : index
    %137 = vector.load %arg16[%c0_68, %c0_69, %c0_70] : memref<2x128x32xbf16, #tpu.memory_space<vmem>>, vector<1x128x32xbf16>
    %138 = vector.shape_cast %137 : vector<1x128x32xbf16> to vector<128x32xbf16>
    %cst_71 = arith.constant dense<0.000000e+00> : vector<8x32xf32>
    %139 = tpu.matmul %136, %138, %cst_71 {dimension_numbers = #tpu.dot_dimension_numbers<[1], [0], [0], [1], [0, 0, 1, 1], [], []>} : vector<8x128xbf16>, vector<128x32xbf16>, vector<8x32xf32> -> vector<8x32xf32>
    %c0_72 = arith.constant 0 : index
    %c0_73 = arith.constant 0 : index
    %c0_74 = arith.constant 0 : index
    %140 = vector.load %arg17[%c0_72, %c0_73, %c0_74] : memref<2x1x32xf32, #tpu.memory_space<vmem>>, vector<1x1x32xf32>
    %141 = vector.shape_cast %140 : vector<1x1x32xf32> to vector<1x32xf32>
    %142 = vector.broadcast %141 : vector<1x32xf32> to vector<8x32xf32>
    %143 = arith.addf %139, %142 : vector<8x32xf32>
    %144 = arith.addf %99, %143 : vector<8x32xf32>
    %c1 = arith.constant 1 : index
    %c0_75 = arith.constant 0 : index
    %c0_76 = arith.constant 0 : index
    %145 = vector.load %arg2[%c1, %c0_75, %c0_76] : memref<2x1x32xf32, #tpu.memory_space<vmem>>, vector<1x1x32xf32>
    %146 = vector.shape_cast %145 : vector<1x1x32xf32> to vector<1x32xf32>
    %c1_77 = arith.constant 1 : index
    %c0_78 = arith.constant 0 : index
    %c0_79 = arith.constant 0 : index
    %147 = vector.load %arg3[%c1_77, %c0_78, %c0_79] : memref<2x1x32xf32, #tpu.memory_space<vmem>>, vector<1x1x32xf32>
    %148 = vector.shape_cast %147 : vector<1x1x32xf32> to vector<1x32xf32>
    %cst_80 = arith.constant dense<0.000000e+00> : vector<8xf32>
    %149 = vector.multi_reduction <add>, %144, %cst_80 [1] : vector<8x32xf32> to vector<8xf32>
    %150 = vector.shape_cast %149 : vector<8xf32> to vector<8x1xf32>
    %cst_81 = arith.constant 3.200000e+01 : f32
    %151 = vector.broadcast %cst_81 : f32 to vector<8x1xf32>
    %152 = arith.divf %150, %151 : vector<8x1xf32>
    %153 = vector.broadcast %152 : vector<8x1xf32> to vector<8x32xf32>
    %154 = arith.subf %144, %153 : vector<8x32xf32>
    %155 = arith.mulf %154, %154 : vector<8x32xf32>
    %cst_82 = arith.constant dense<0.000000e+00> : vector<8xf32>
    %156 = vector.multi_reduction <add>, %155, %cst_82 [1] : vector<8x32xf32> to vector<8xf32>
    %157 = vector.shape_cast %156 : vector<8xf32> to vector<8x1xf32>
    %cst_83 = arith.constant 3.200000e+01 : f32
    %158 = vector.broadcast %cst_83 : f32 to vector<8x1xf32>
    %159 = arith.divf %157, %158 : vector<8x1xf32>
    %160 = vector.broadcast %152 : vector<8x1xf32> to vector<8x32xf32>
    %161 = arith.subf %144, %160 : vector<8x32xf32>
    %cst_84 = arith.constant 9.99999974E-6 : f32
    %162 = vector.broadcast %cst_84 : f32 to vector<8x1xf32>
    %163 = arith.addf %159, %162 : vector<8x1xf32>
    %164 = math.rsqrt %163 : vector<8x1xf32>
    %165 = vector.broadcast %164 : vector<8x1xf32> to vector<8x32xf32>
    %166 = arith.mulf %161, %165 : vector<8x32xf32>
    %167 = vector.broadcast %146 : vector<1x32xf32> to vector<8x32xf32>
    %168 = arith.mulf %166, %167 : vector<8x32xf32>
    %169 = vector.broadcast %148 : vector<1x32xf32> to vector<8x32xf32>
    %170 = arith.addf %168, %169 : vector<8x32xf32>
    %171 = arith.truncf %170 : vector<8x32xf32> to vector<8x32xbf16>
    %c1_85 = arith.constant 1 : index
    %c0_86 = arith.constant 0 : index
    %c0_87 = arith.constant 0 : index
    %172 = vector.load %arg4[%c1_85, %c0_86, %c0_87] : memref<2x32x32xbf16, #tpu.memory_space<vmem>>, vector<1x32x32xbf16>
    %173 = vector.shape_cast %172 : vector<1x32x32xbf16> to vector<32x32xbf16>
    %cst_88 = arith.constant dense<0.000000e+00> : vector<8x32xf32>
    %174 = tpu.matmul %171, %173, %cst_88 {dimension_numbers = #tpu.dot_dimension_numbers<[1], [0], [0], [1], [0, 0, 1, 1], [], []>} : vector<8x32xbf16>, vector<32x32xbf16>, vector<8x32xf32> -> vector<8x32xf32>
    %c1_89 = arith.constant 1 : index
    %c0_90 = arith.constant 0 : index
    %c0_91 = arith.constant 0 : index
    %175 = vector.load %arg5[%c1_89, %c0_90, %c0_91] : memref<2x1x32xf32, #tpu.memory_space<vmem>>, vector<1x1x32xf32>
    %176 = vector.shape_cast %175 : vector<1x1x32xf32> to vector<1x32xf32>
    %177 = vector.broadcast %176 : vector<1x32xf32> to vector<8x32xf32>
    %178 = arith.addf %174, %177 : vector<8x32xf32>
    %c1_92 = arith.constant 1 : index
    %c0_93 = arith.constant 0 : index
    %c0_94 = arith.constant 0 : index
    %179 = vector.load %arg6[%c1_92, %c0_93, %c0_94] : memref<2x32x32xbf16, #tpu.memory_space<vmem>>, vector<1x32x32xbf16>
    %180 = vector.shape_cast %179 : vector<1x32x32xbf16> to vector<32x32xbf16>
    %cst_95 = arith.constant dense<0.000000e+00> : vector<8x32xf32>
    %181 = tpu.matmul %171, %180, %cst_95 {dimension_numbers = #tpu.dot_dimension_numbers<[1], [0], [0], [1], [0, 0, 1, 1], [], []>} : vector<8x32xbf16>, vector<32x32xbf16>, vector<8x32xf32> -> vector<8x32xf32>
    %c1_96 = arith.constant 1 : index
    %c0_97 = arith.constant 0 : index
    %c0_98 = arith.constant 0 : index
    %182 = vector.load %arg7[%c1_96, %c0_97, %c0_98] : memref<2x1x32xf32, #tpu.memory_space<vmem>>, vector<1x1x32xf32>
    %183 = vector.shape_cast %182 : vector<1x1x32xf32> to vector<1x32xf32>
    %184 = vector.broadcast %183 : vector<1x32xf32> to vector<8x32xf32>
    %185 = arith.addf %181, %184 : vector<8x32xf32>
    %c1_99 = arith.constant 1 : index
    %c0_100 = arith.constant 0 : index
    %c0_101 = arith.constant 0 : index
    %186 = vector.load %arg8[%c1_99, %c0_100, %c0_101] : memref<2x32x32xbf16, #tpu.memory_space<vmem>>, vector<1x32x32xbf16>
    %187 = vector.shape_cast %186 : vector<1x32x32xbf16> to vector<32x32xbf16>
    %cst_102 = arith.constant dense<0.000000e+00> : vector<8x32xf32>
    %188 = tpu.matmul %171, %187, %cst_102 {dimension_numbers = #tpu.dot_dimension_numbers<[1], [0], [0], [1], [0, 0, 1, 1], [], []>} : vector<8x32xbf16>, vector<32x32xbf16>, vector<8x32xf32> -> vector<8x32xf32>
    %c1_103 = arith.constant 1 : index
    %c0_104 = arith.constant 0 : index
    %c0_105 = arith.constant 0 : index
    %189 = vector.load %arg9[%c1_103, %c0_104, %c0_105] : memref<2x1x32xf32, #tpu.memory_space<vmem>>, vector<1x1x32xf32>
    %190 = vector.shape_cast %189 : vector<1x1x32xf32> to vector<1x32xf32>
    %191 = vector.broadcast %190 : vector<1x32xf32> to vector<8x32xf32>
    %192 = arith.addf %188, %191 : vector<8x32xf32>
    %cst_106 = arith.constant 2.500000e-01 : f32
    %193 = vector.broadcast %cst_106 : f32 to vector<8x32xf32>
    %194 = arith.mulf %178, %193 : vector<8x32xf32>
    %195 = vector.extract_strided_slice %194 {offsets = [0, 0], sizes = [8, 16], strides = [1, 1]} : vector<8x32xf32> to vector<8x16xf32>
    %196 = arith.truncf %195 : vector<8x16xf32> to vector<8x16xbf16>
    %197 = vector.extract_strided_slice %185 {offsets = [0, 0], sizes = [8, 16], strides = [1, 1]} : vector<8x32xf32> to vector<8x16xf32>
    %198 = arith.truncf %197 : vector<8x16xf32> to vector<8x16xbf16>
    %199 = vector.extract_strided_slice %192 {offsets = [0, 0], sizes = [8, 16], strides = [1, 1]} : vector<8x32xf32> to vector<8x16xf32>
    %200 = arith.truncf %199 : vector<8x16xf32> to vector<8x16xbf16>
    "tpu.trace_start"() <{level = 10 : i32, message = "qd,kd->qk"}> : () -> ()
    %cst_107 = arith.constant dense<0.000000e+00> : vector<8x8xf32>
    %201 = tpu.matmul %196, %198, %cst_107 {dimension_numbers = #tpu.dot_dimension_numbers<[1], [1], [0], [0], [0, 0, 1, 0], [], []>} : vector<8x16xbf16>, vector<8x16xbf16>, vector<8x8xf32> -> vector<8x8xf32>
    "tpu.trace_stop"() : () -> ()
    %cst_108 = arith.constant dense<0xFF800000> : vector<8xf32>
    %202 = vector.multi_reduction <maximumf>, %201, %cst_108 [1] : vector<8x8xf32> to vector<8xf32>
    %203 = vector.shape_cast %202 : vector<8xf32> to vector<8x1xf32>
    %204 = vector.broadcast %203 : vector<8x1xf32> to vector<8x8xf32>
    %205 = arith.subf %201, %204 : vector<8x8xf32>
    %206 = math.exp %205 : vector<8x8xf32>
    %cst_109 = arith.constant dense<0.000000e+00> : vector<8xf32>
    %207 = vector.multi_reduction <add>, %206, %cst_109 [1] : vector<8x8xf32> to vector<8xf32>
    %208 = vector.shape_cast %207 : vector<8xf32> to vector<8x1xf32>
    %209 = tpu.reciprocal %208 {approx = true} : vector<8x1xf32> -> vector<8x1xf32>
    %210 = vector.broadcast %209 : vector<8x1xf32> to vector<8x8xf32>
    %211 = arith.mulf %206, %210 : vector<8x8xf32>
    %212 = arith.truncf %211 : vector<8x8xf32> to vector<8x8xbf16>
    %cst_110 = arith.constant dense<0.000000e+00> : vector<8x16xf32>
    %213 = tpu.matmul %212, %200, %cst_110 {dimension_numbers = #tpu.dot_dimension_numbers<[1], [0], [0], [1], [0, 0, 1, 1], [], []>} : vector<8x8xbf16>, vector<8x16xbf16>, vector<8x16xf32> -> vector<8x16xf32>
    %214 = vector.extract_strided_slice %194 {offsets = [0, 16], sizes = [8, 16], strides = [1, 1]} : vector<8x32xf32> to vector<8x16xf32>
    %215 = arith.truncf %214 : vector<8x16xf32> to vector<8x16xbf16>
    %216 = vector.extract_strided_slice %185 {offsets = [0, 16], sizes = [8, 16], strides = [1, 1]} : vector<8x32xf32> to vector<8x16xf32>
    %217 = arith.truncf %216 : vector<8x16xf32> to vector<8x16xbf16>
    %218 = vector.extract_strided_slice %192 {offsets = [0, 16], sizes = [8, 16], strides = [1, 1]} : vector<8x32xf32> to vector<8x16xf32>
    %219 = arith.truncf %218 : vector<8x16xf32> to vector<8x16xbf16>
    "tpu.trace_start"() <{level = 10 : i32, message = "qd,kd->qk"}> : () -> ()
    %cst_111 = arith.constant dense<0.000000e+00> : vector<8x8xf32>
    %220 = tpu.matmul %215, %217, %cst_111 {dimension_numbers = #tpu.dot_dimension_numbers<[1], [1], [0], [0], [0, 0, 1, 0], [], []>} : vector<8x16xbf16>, vector<8x16xbf16>, vector<8x8xf32> -> vector<8x8xf32>
    "tpu.trace_stop"() : () -> ()
    %cst_112 = arith.constant dense<0xFF800000> : vector<8xf32>
    %221 = vector.multi_reduction <maximumf>, %220, %cst_112 [1] : vector<8x8xf32> to vector<8xf32>
    %222 = vector.shape_cast %221 : vector<8xf32> to vector<8x1xf32>
    %223 = vector.broadcast %222 : vector<8x1xf32> to vector<8x8xf32>
    %224 = arith.subf %220, %223 : vector<8x8xf32>
    %225 = math.exp %224 : vector<8x8xf32>
    %cst_113 = arith.constant dense<0.000000e+00> : vector<8xf32>
    %226 = vector.multi_reduction <add>, %225, %cst_113 [1] : vector<8x8xf32> to vector<8xf32>
    %227 = vector.shape_cast %226 : vector<8xf32> to vector<8x1xf32>
    %228 = tpu.reciprocal %227 {approx = true} : vector<8x1xf32> -> vector<8x1xf32>
    %229 = vector.broadcast %228 : vector<8x1xf32> to vector<8x8xf32>
    %230 = arith.mulf %225, %229 : vector<8x8xf32>
    %231 = arith.truncf %230 : vector<8x8xf32> to vector<8x8xbf16>
    %cst_114 = arith.constant dense<0.000000e+00> : vector<8x16xf32>
    %232 = tpu.matmul %231, %219, %cst_114 {dimension_numbers = #tpu.dot_dimension_numbers<[1], [0], [0], [1], [0, 0, 1, 1], [], []>} : vector<8x8xbf16>, vector<8x16xbf16>, vector<8x16xf32> -> vector<8x16xf32>
    %233 = tpu.concatenate %213, %232 in 1 : vector<8x16xf32>, vector<8x16xf32> -> vector<8x32xf32>
    %234 = arith.truncf %233 : vector<8x32xf32> to vector<8x32xbf16>
    %c1_115 = arith.constant 1 : index
    %c0_116 = arith.constant 0 : index
    %c0_117 = arith.constant 0 : index
    %235 = vector.load %arg10[%c1_115, %c0_116, %c0_117] : memref<2x32x32xbf16, #tpu.memory_space<vmem>>, vector<1x32x32xbf16>
    %236 = vector.shape_cast %235 : vector<1x32x32xbf16> to vector<32x32xbf16>
    %cst_118 = arith.constant dense<0.000000e+00> : vector<8x32xf32>
    %237 = tpu.matmul %234, %236, %cst_118 {dimension_numbers = #tpu.dot_dimension_numbers<[1], [0], [0], [1], [0, 0, 1, 1], [], []>} : vector<8x32xbf16>, vector<32x32xbf16>, vector<8x32xf32> -> vector<8x32xf32>
    %c1_119 = arith.constant 1 : index
    %c0_120 = arith.constant 0 : index
    %c0_121 = arith.constant 0 : index
    %238 = vector.load %arg11[%c1_119, %c0_120, %c0_121] : memref<2x1x32xf32, #tpu.memory_space<vmem>>, vector<1x1x32xf32>
    %239 = vector.shape_cast %238 : vector<1x1x32xf32> to vector<1x32xf32>
    %240 = vector.broadcast %239 : vector<1x32xf32> to vector<8x32xf32>
    %241 = arith.addf %237, %240 : vector<8x32xf32>
    %242 = arith.addf %144, %241 : vector<8x32xf32>
    %c1_122 = arith.constant 1 : index
    %c0_123 = arith.constant 0 : index
    %c0_124 = arith.constant 0 : index
    %243 = vector.load %arg12[%c1_122, %c0_123, %c0_124] : memref<2x1x32xf32, #tpu.memory_space<vmem>>, vector<1x1x32xf32>
    %244 = vector.shape_cast %243 : vector<1x1x32xf32> to vector<1x32xf32>
    %c1_125 = arith.constant 1 : index
    %c0_126 = arith.constant 0 : index
    %c0_127 = arith.constant 0 : index
    %245 = vector.load %arg13[%c1_125, %c0_126, %c0_127] : memref<2x1x32xf32, #tpu.memory_space<vmem>>, vector<1x1x32xf32>
    %246 = vector.shape_cast %245 : vector<1x1x32xf32> to vector<1x32xf32>
    %cst_128 = arith.constant dense<0.000000e+00> : vector<8xf32>
    %247 = vector.multi_reduction <add>, %242, %cst_128 [1] : vector<8x32xf32> to vector<8xf32>
    %248 = vector.shape_cast %247 : vector<8xf32> to vector<8x1xf32>
    %cst_129 = arith.constant 3.200000e+01 : f32
    %249 = vector.broadcast %cst_129 : f32 to vector<8x1xf32>
    %250 = arith.divf %248, %249 : vector<8x1xf32>
    %251 = vector.broadcast %250 : vector<8x1xf32> to vector<8x32xf32>
    %252 = arith.subf %242, %251 : vector<8x32xf32>
    %253 = arith.mulf %252, %252 : vector<8x32xf32>
    %cst_130 = arith.constant dense<0.000000e+00> : vector<8xf32>
    %254 = vector.multi_reduction <add>, %253, %cst_130 [1] : vector<8x32xf32> to vector<8xf32>
    %255 = vector.shape_cast %254 : vector<8xf32> to vector<8x1xf32>
    %cst_131 = arith.constant 3.200000e+01 : f32
    %256 = vector.broadcast %cst_131 : f32 to vector<8x1xf32>
    %257 = arith.divf %255, %256 : vector<8x1xf32>
    %258 = vector.broadcast %250 : vector<8x1xf32> to vector<8x32xf32>
    %259 = arith.subf %242, %258 : vector<8x32xf32>
    %cst_132 = arith.constant 9.99999974E-6 : f32
    %260 = vector.broadcast %cst_132 : f32 to vector<8x1xf32>
    %261 = arith.addf %257, %260 : vector<8x1xf32>
    %262 = math.rsqrt %261 : vector<8x1xf32>
    %263 = vector.broadcast %262 : vector<8x1xf32> to vector<8x32xf32>
    %264 = arith.mulf %259, %263 : vector<8x32xf32>
    %265 = vector.broadcast %244 : vector<1x32xf32> to vector<8x32xf32>
    %266 = arith.mulf %264, %265 : vector<8x32xf32>
    %267 = vector.broadcast %246 : vector<1x32xf32> to vector<8x32xf32>
    %268 = arith.addf %266, %267 : vector<8x32xf32>
    %269 = arith.truncf %268 : vector<8x32xf32> to vector<8x32xbf16>
    %c1_133 = arith.constant 1 : index
    %c0_134 = arith.constant 0 : index
    %c0_135 = arith.constant 0 : index
    %270 = vector.load %arg14[%c1_133, %c0_134, %c0_135] : memref<2x32x128xbf16, #tpu.memory_space<vmem>>, vector<1x32x128xbf16>
    %271 = vector.shape_cast %270 : vector<1x32x128xbf16> to vector<32x128xbf16>
    %cst_136 = arith.constant dense<0.000000e+00> : vector<8x128xf32>
    %272 = tpu.matmul %269, %271, %cst_136 {dimension_numbers = #tpu.dot_dimension_numbers<[1], [0], [0], [1], [0, 0, 1, 1], [], []>} : vector<8x32xbf16>, vector<32x128xbf16>, vector<8x128xf32> -> vector<8x128xf32>
    %c1_137 = arith.constant 1 : index
    %c0_138 = arith.constant 0 : index
    %c0_139 = arith.constant 0 : index
    %273 = vector.load %arg15[%c1_137, %c0_138, %c0_139] : memref<2x1x128xf32, #tpu.memory_space<vmem>>, vector<1x1x128xf32>
    %274 = vector.shape_cast %273 : vector<1x1x128xf32> to vector<1x128xf32>
    %275 = vector.broadcast %274 : vector<1x128xf32> to vector<8x128xf32>
    %276 = arith.addf %272, %275 : vector<8x128xf32>
    %cst_140 = arith.constant 0.000000e+00 : f32
    %277 = vector.broadcast %cst_140 : f32 to vector<8x128xf32>
    %278 = arith.maximumf %276, %277 : vector<8x128xf32>
    %279 = arith.truncf %278 : vector<8x128xf32> to vector<8x128xbf16>
    %c1_141 = arith.constant 1 : index
    %c0_142 = arith.constant 0 : index
    %c0_143 = arith.constant 0 : index
    %280 = vector.load %arg16[%c1_141, %c0_142, %c0_143] : memref<2x128x32xbf16, #tpu.memory_space<vmem>>, vector<1x128x32xbf16>
    %281 = vector.shape_cast %280 : vector<1x128x32xbf16> to vector<128x32xbf16>
    %cst_144 = arith.constant dense<0.000000e+00> : vector<8x32xf32>
    %282 = tpu.matmul %279, %281, %cst_144 {dimension_numbers = #tpu.dot_dimension_numbers<[1], [0], [0], [1], [0, 0, 1, 1], [], []>} : vector<8x128xbf16>, vector<128x32xbf16>, vector<8x32xf32> -> vector<8x32xf32>
    %c1_145 = arith.constant 1 : index
    %c0_146 = arith.constant 0 : index
    %c0_147 = arith.constant 0 : index
    %283 = vector.load %arg17[%c1_145, %c0_146, %c0_147] : memref<2x1x32xf32, #tpu.memory_space<vmem>>, vector<1x1x32xf32>
    %284 = vector.shape_cast %283 : vector<1x1x32xf32> to vector<1x32xf32>
    %285 = vector.broadcast %284 : vector<1x32xf32> to vector<8x32xf32>
    %286 = arith.addf %282, %285 : vector<8x32xf32>
    %287 = arith.addf %242, %286 : vector<8x32xf32>
    %c0_148 = arith.constant 0 : index
    %c0_149 = arith.constant 0 : index
    %288 = vector.load %arg18[%c0_148, %c0_149] : memref<1x32xf32, #tpu.memory_space<vmem>>, vector<1x32xf32>
    %c0_150 = arith.constant 0 : index
    %c0_151 = arith.constant 0 : index
    %289 = vector.load %arg19[%c0_150, %c0_151] : memref<1x32xf32, #tpu.memory_space<vmem>>, vector<1x32xf32>
    %cst_152 = arith.constant dense<0.000000e+00> : vector<8xf32>
    %290 = vector.multi_reduction <add>, %287, %cst_152 [1] : vector<8x32xf32> to vector<8xf32>
    %291 = vector.shape_cast %290 : vector<8xf32> to vector<8x1xf32>
    %cst_153 = arith.constant 3.200000e+01 : f32
    %292 = vector.broadcast %cst_153 : f32 to vector<8x1xf32>
    %293 = arith.divf %291, %292 : vector<8x1xf32>
    %294 = vector.broadcast %293 : vector<8x1xf32> to vector<8x32xf32>
    %295 = arith.subf %287, %294 : vector<8x32xf32>
    %296 = arith.mulf %295, %295 : vector<8x32xf32>
    %cst_154 = arith.constant dense<0.000000e+00> : vector<8xf32>
    %297 = vector.multi_reduction <add>, %296, %cst_154 [1] : vector<8x32xf32> to vector<8xf32>
    %298 = vector.shape_cast %297 : vector<8xf32> to vector<8x1xf32>
    %cst_155 = arith.constant 3.200000e+01 : f32
    %299 = vector.broadcast %cst_155 : f32 to vector<8x1xf32>
    %300 = arith.divf %298, %299 : vector<8x1xf32>
    %301 = vector.broadcast %293 : vector<8x1xf32> to vector<8x32xf32>
    %302 = arith.subf %287, %301 : vector<8x32xf32>
    %cst_156 = arith.constant 9.99999974E-6 : f32
    %303 = vector.broadcast %cst_156 : f32 to vector<8x1xf32>
    %304 = arith.addf %300, %303 : vector<8x1xf32>
    %305 = math.rsqrt %304 : vector<8x1xf32>
    %306 = vector.broadcast %305 : vector<8x1xf32> to vector<8x32xf32>
    %307 = arith.mulf %302, %306 : vector<8x32xf32>
    %308 = vector.broadcast %288 : vector<1x32xf32> to vector<8x32xf32>
    %309 = arith.mulf %307, %308 : vector<8x32xf32>
    %310 = vector.broadcast %289 : vector<1x32xf32> to vector<8x32xf32>
    %311 = arith.addf %309, %310 : vector<8x32xf32>
    %312 = arith.truncf %311 : vector<8x32xf32> to vector<8x32xbf16>
    %c0_157 = arith.constant 0 : index
    %c0_158 = arith.constant 0 : index
    %313 = vector.load %arg20[%c0_157, %c0_158] : memref<32x128xbf16, #tpu.memory_space<vmem>>, vector<32x128xbf16>
    %cst_159 = arith.constant dense<0.000000e+00> : vector<8x128xf32>
    %314 = tpu.matmul %312, %313, %cst_159 {dimension_numbers = #tpu.dot_dimension_numbers<[1], [0], [0], [1], [0, 0, 1, 1], [], []>} : vector<8x32xbf16>, vector<32x128xbf16>, vector<8x128xf32> -> vector<8x128xf32>
    %c0_160 = arith.constant 0 : index
    %c0_161 = arith.constant 0 : index
    %c0_162 = arith.constant 0 : index
    %315 = vector.load %arg21[%c0_160, %c0_161, %c0_162] : memref<1x8x128xf32, #tpu.memory_space<vmem>>, vector<1x8x128xf32>
    %316 = vector.shape_cast %315 : vector<1x8x128xf32> to vector<8x128xf32>
    %317 = vector.shape_cast %314 : vector<8x128xf32> to vector<1x8x128xf32>
    tpu.vector_store %arg21[%c0_160, %c0_161, %c0_162], %317 {strides = array<i32>} : memref<1x8x128xf32, #tpu.memory_space<vmem>>, vector<1x8x128xf32>,
    return
  }
  func.func @transform_0(%arg0: i32) -> (i32, i32, i32) {
    %c0_i32 = arith.constant 0 : i32
    %c0_i32_0 = arith.constant 0 : i32
    %c0_i32_1 = arith.constant 0 : i32
    return %arg0, %c0_i32, %c0_i32_0 : i32, i32, i32
  }
  func.func @transform_1(%arg0: i32) -> (i32, i32, i32) {
    %c0_i32 = arith.constant 0 : i32
    %c0_i32_0 = arith.constant 0 : i32
    %c0_i32_1 = arith.constant 0 : i32
    %c0_i32_2 = arith.constant 0 : i32
    return %c0_i32, %c0_i32_0, %c0_i32_1 : i32, i32, i32
  }
  func.func @transform_2(%arg0: i32) -> (i32, i32, i32) {
    %c0_i32 = arith.constant 0 : i32
    %c0_i32_0 = arith.constant 0 : i32
    %c0_i32_1 = arith.constant 0 : i32
    %c0_i32_2 = arith.constant 0 : i32
    return %c0_i32, %c0_i32_0, %c0_i32_1 : i32, i32, i32
  }
  func.func @transform_3(%arg0: i32) -> (i32, i32, i32) {
    %c0_i32 = arith.constant 0 : i32
    %c0_i32_0 = arith.constant 0 : i32
    %c0_i32_1 = arith.constant 0 : i32
    %c0_i32_2 = arith.constant 0 : i32
    return %c0_i32, %c0_i32_0, %c0_i32_1 : i32, i32, i32
  }
  func.func @transform_4(%arg0: i32) -> (i32, i32, i32) {
    %c0_i32 = arith.constant 0 : i32
    %c0_i32_0 = arith.constant 0 : i32
    %c0_i32_1 = arith.constant 0 : i32
    %c0_i32_2 = arith.constant 0 : i32
    return %c0_i32, %c0_i32_0, %c0_i32_1 : i32, i32, i32
  }
  func.func @transform_5(%arg0: i32) -> (i32, i32, i32) {
    %c0_i32 = arith.constant 0 : i32
    %c0_i32_0 = arith.constant 0 : i32
    %c0_i32_1 = arith.constant 0 : i32
    %c0_i32_2 = arith.constant 0 : i32
    return %c0_i32, %c0_i32_0, %c0_i32_1 : i32, i32, i32
  }
  func.func @transform_6(%arg0: i32) -> (i32, i32, i32) {
    %c0_i32 = arith.constant 0 : i32
    %c0_i32_0 = arith.constant 0 : i32
    %c0_i32_1 = arith.constant 0 : i32
    %c0_i32_2 = arith.constant 0 : i32
    return %c0_i32, %c0_i32_0, %c0_i32_1 : i32, i32, i32
  }
  func.func @transform_7(%arg0: i32) -> (i32, i32, i32) {
    %c0_i32 = arith.constant 0 : i32
    %c0_i32_0 = arith.constant 0 : i32
    %c0_i32_1 = arith.constant 0 : i32
    %c0_i32_2 = arith.constant 0 : i32
    return %c0_i32, %c0_i32_0, %c0_i32_1 : i32, i32, i32
  }
  func.func @transform_8(%arg0: i32) -> (i32, i32, i32) {
    %c0_i32 = arith.constant 0 : i32
    %c0_i32_0 = arith.constant 0 : i32
    %c0_i32_1 = arith.constant 0 : i32
    %c0_i32_2 = arith.constant 0 : i32
    return %c0_i32, %c0_i32_0, %c0_i32_1 : i32, i32, i32
  }
  func.func @transform_9(%arg0: i32) -> (i32, i32, i32) {
    %c0_i32 = arith.constant 0 : i32
    %c0_i32_0 = arith.constant 0 : i32
    %c0_i32_1 = arith.constant 0 : i32
    %c0_i32_2 = arith.constant 0 : i32
    return %c0_i32, %c0_i32_0, %c0_i32_1 : i32, i32, i32
  }
  func.func @transform_10(%arg0: i32) -> (i32, i32, i32) {
    %c0_i32 = arith.constant 0 : i32
    %c0_i32_0 = arith.constant 0 : i32
    %c0_i32_1 = arith.constant 0 : i32
    %c0_i32_2 = arith.constant 0 : i32
    return %c0_i32, %c0_i32_0, %c0_i32_1 : i32, i32, i32
  }
  func.func @transform_11(%arg0: i32) -> (i32, i32, i32) {
    %c0_i32 = arith.constant 0 : i32
    %c0_i32_0 = arith.constant 0 : i32
    %c0_i32_1 = arith.constant 0 : i32
    %c0_i32_2 = arith.constant 0 : i32
    return %c0_i32, %c0_i32_0, %c0_i32_1 : i32, i32, i32
  }
  func.func @transform_12(%arg0: i32) -> (i32, i32, i32) {
    %c0_i32 = arith.constant 0 : i32
    %c0_i32_0 = arith.constant 0 : i32
    %c0_i32_1 = arith.constant 0 : i32
    %c0_i32_2 = arith.constant 0 : i32
    return %c0_i32, %c0_i32_0, %c0_i32_1 : i32, i32, i32
  }
  func.func @transform_13(%arg0: i32) -> (i32, i32, i32) {
    %c0_i32 = arith.constant 0 : i32
    %c0_i32_0 = arith.constant 0 : i32
    %c0_i32_1 = arith.constant 0 : i32
    %c0_i32_2 = arith.constant 0 : i32
    return %c0_i32, %c0_i32_0, %c0_i32_1 : i32, i32, i32
  }
  func.func @transform_14(%arg0: i32) -> (i32, i32, i32) {
    %c0_i32 = arith.constant 0 : i32
    %c0_i32_0 = arith.constant 0 : i32
    %c0_i32_1 = arith.constant 0 : i32
    %c0_i32_2 = arith.constant 0 : i32
    return %c0_i32, %c0_i32_0, %c0_i32_1 : i32, i32, i32
  }
  func.func @transform_15(%arg0: i32) -> (i32, i32, i32) {
    %c0_i32 = arith.constant 0 : i32
    %c0_i32_0 = arith.constant 0 : i32
    %c0_i32_1 = arith.constant 0 : i32
    %c0_i32_2 = arith.constant 0 : i32
    return %c0_i32, %c0_i32_0, %c0_i32_1 : i32, i32, i32
  }
  func.func @transform_16(%arg0: i32) -> (i32, i32, i32) {
    %c0_i32 = arith.constant 0 : i32
    %c0_i32_0 = arith.constant 0 : i32
    %c0_i32_1 = arith.constant 0 : i32
    %c0_i32_2 = arith.constant 0 : i32
    return %c0_i32, %c0_i32_0, %c0_i32_1 : i32, i32, i32
  }
  func.func @transform_17(%arg0: i32) -> (i32, i32) {
    %c0_i32 = arith.constant 0 : i32
    %c0_i32_0 = arith.constant 0 : i32
    %c0_i32_1 = arith.constant 0 : i32
    return %c0_i32, %c0_i32_0 : i32, i32
  }
  func.func @transform_18(%arg0: i32) -> (i32, i32) {
    %c0_i32 = arith.constant 0 : i32
    %c0_i32_0 = arith.constant 0 : i32
    %c0_i32_1 = arith.constant 0 : i32
    return %c0_i32, %c0_i32_0 : i32, i32
  }
  func.func @transform_19(%arg0: i32) -> (i32, i32) {
    %c0_i32 = arith.constant 0 : i32
    %c0_i32_0 = arith.constant 0 : i32
    %c0_i32_1 = arith.constant 0 : i32
    return %c0_i32, %c0_i32_0 : i32, i32
  }
  func.func @transform_20(%arg0: i32) -> (i32, i32, i32) {
    %c0_i32 = arith.constant 0 : i32
    %c0_i32_0 = arith.constant 0 : i32
    %c0_i32_1 = arith.constant 0 : i32
    return %arg0, %c0_i32, %c0_i32_0 : i32, i32, i32
  }
}

</mosaic_0001>

<bundles_post_ra>
// kernel: generic_model_forward.1
= control target key start
LH: loop header
LB: loop body
LE: loop exit
PB: predicated region body
PF: predicated region fallthrough
CT: control target
= control target key end

     0   :  { %s3365_s0 = inlined_call_operand.vmem [shape: f32[2,8,32], index: 0, kind: input, shape index: {}]   ;;  %s3366_s1 = inlined_call_operand.vmem [shape: f32[2,1,32], index: 1, kind: input, shape index: {}]   ;;  %s3367_s2 = inlined_call_operand.vmem [shape: f32[2,1,32], index: 2, kind: input, shape index: {}]   ;;  %s3368_s3 = inlined_call_operand.vmem [shape: bf16[2,32,32], index: 3, kind: input, shape index: {}]   ;;  %s3369_s4 = inlined_call_operand.vmem [shape: f32[2,1,32], index: 4, kind: input, shape index: {}]   ;;  %s3370_s5 = inlined_call_operand.vmem [shape: bf16[2,32,32], index: 5, kind: input, shape index: {}]   ;;  %s3371_s6 = inlined_call_operand.vmem [shape: f32[2,1,32], index: 6, kind: input, shape index: {}]   ;;  %s3372_s7 = inlined_call_operand.vmem [shape: bf16[2,32,32], index: 7, kind: input, shape index: {}]   ;;  %s3373_s8 = inlined_call_operand.vmem [shape: f32[2,1,32], index: 8, kind: input, shape index: {}]   ;;  %s3374_s9 = inlined_call_operand.vmem [shape: bf16[2,32,32], index: 9, kind: input, shape index: {}]   ;;  %s3375_s10 = inlined_call_operand.vmem [shape: f32[2,1,32], index: 10, kind: input, shape index: {}]   ;;  %s3376_s11 = inlined_call_operand.vmem [shape: f32[2,1,32], index: 11, kind: input, shape index: {}]   ;;  %s3377_s12 = inlined_call_operand.vmem [shape: f32[2,1,32], index: 12, kind: input, shape index: {}]   ;;  %s3378_s13 = inlined_call_operand.vmem [shape: bf16[2,32,128], index: 13, kind: input, shape index: {}]   ;;  %s3379_s14 = inlined_call_operand.vmem [shape: f32[2,1,128], index: 14, kind: input, shape index: {}]   ;;  %s3380_s15 = inlined_call_operand.vmem [shape: bf16[2,128,32], index: 15, kind: input, shape index: {}]   ;;  %s3381_s16 = inlined_call_operand.vmem [shape: f32[2,1,32], index: 16, kind: input, shape index: {}]   ;;  %s3382_s17 = inlined_call_operand.vmem [shape: f32[1,32], index: 17, kind: input, shape index: {}]   ;;  %s3383_s18 = inlined_call_operand.vmem [shape: f32[1,32], index: 18, kind: input, shape index: {}]   ;;  %s3384_s19 = inlined_call_operand.vmem [shape: bf16[32,128], index: 19, kind: input, shape index: {}]   ;;  %s3385_s20 = inlined_call_operand.hbm [shape: f32[2,8,128], index: 20, kind: output, shape index: {}]  }
   0x1   :  { %3401 = sst [smem:[#allocation11_spill]] %s3365_s0 }
   0x2   :  { %3402 = sst [smem:[#allocation12_spill]] %s3366_s1 }
   0x3   :  { %3403 = sst [smem:[#allocation13_spill]] %s3367_s2 }
   0x4   :  { %3404 = sst [smem:[#allocation14_spill]] %s3368_s3 }
   0x5   :  { %3405 = sst [smem:[#allocation15_spill]] %s3369_s4 }
   0x6   :  { %3406 = sst [smem:[#allocation16_spill]] %s3370_s5 }
   0x7   :  { %25 = vsyncpa [#allocation3], 0 }
   0x8   :  { %27 = vsyncpa [#allocation3 + $0x1], 0  ;;  %s2922_s1 = smov 0   ;;  %s2924_s22 = smov 0  }
   0x9   :  { %s2926_s23 = smov 0   ;;  %s2928_s24 = smov 0  }
   0xa LB: > { %3407 = sst [smem:[#allocation5_spill]] %s2798_s1  ;;  %s2943_s2 = sadd.s32 4294967295, %s2810_s24   ;;  %s2810_s24 = sphi %s2928_s24, %s3427_s24   ;;  %s2806_s23 = sphi %s2926_s23, %s3429_s23   ;;  %s2802_s22 = sphi %s2924_s22, %s3431_s22   ;;  %s2798_s1 = sphi %s2922_s1, %s3430_s1  }
   0xb   : > { %3408 = sst [smem:[#allocation6_spill]] %s2806_s23  ;;  %s2263_s25 = sadd.s32 4294967294, %s2810_s24  }
   0xc   : > { %3409 = sst [smem:[#allocation7_spill]] %s2810_s24  ;;  %s2947_s3 = sadd.s32 1, %s2810_s24  }
   0xd   : > { %3410 = sst [smem:[#allocation8_spill]] %s2947_s3  ;;  %s465_s26 = sadd.s32 1, %s2806_s23 }
   0xe   : > { %s462_s27 = ssub.s32 %s2810_s24, %s2947_s3  ;;  %p475_p0 = scmp.ne.s32.totalorder %s2806_s23, %s2802_s22 }
   0xf   : > { %p463_p1 = scmp.eq.s32.totalorder %s462_s27, 0  ;;  %p476_p2 = scmp.eq.s32.totalorder %s2943_s2, 1 }
  0x10   : > { %p481_p3 = scmp.ne.s32.totalorder %s2802_s22, %s2798_s1  ;;  %p482_p4 = scmp.eq.s32.totalorder %s2263_s25, 1 }
  0x11   : > { %s2958_s28 = scalar_select %p463_p1, %s2806_s23, %s465_s26  }
  0x12   : > { %p2960_p5 = por %p476_p2, %p475_p0  ;;  %p2964_p6 = por %p482_p4, %p481_p3 }
  0x13   : > { %3411 = sst [smem:[#allocation9_spill]] %s2958_s28  ;;  %p2266_p7 = scmp.ge.s32.totalorder %s2810_s24, 1 }
  0x14   : > { %s3413_s29 = scalar_select %p2964_p6, 1, 0 }
  0x15   : > { %p564_p8 = scmp.lt.s32.totalorder %s2810_s24, 3 }
  0x16   : > { %3414 = sst [smem:[#allocation10_spill]] %s3413_s29 }
  0x17   : > { %p565_p9 = pnand %p2266_p7, %p564_p8 }
  0x18   : > { %p621_p10 = scmp.lt.s32.totalorder (!%p565_p9), %s2943_s2, 1  ;;  %vm629_vm0 = vcmask (!%p565_p9), 261120   ;;  %s3415_s26 = sld [smem:[#allocation11_spill]] (!%p565_p9)  ;;  %v2685_v8 = vld [vmem:[%s3372_s7] sm:$0xff] (!%p565_p9)   ;;  %v2812_v9 = vmov (!%p565_p9), 0.0   ;;  %v2687_v11 = vld [vmem:[%s3372_s7 + $0x8] sm:$0xff] (!%p565_p9)  }
  0x19   : > { %568 = sbr.rel (%p565_p9) target bundleno = 5549 (0x15ad), region = 100  ;;  %s3416_s23 = sld [smem:[#allocation14_spill]] (!%p565_p9)  ;;  %2465 = vmatprep.subr.bf16.mxu1 (!%p565_p9), %v2812_v9  ;;  %2481 = vmatprep.subr.bf16.mxu0 (!%p565_p9), %v2812_v9  ;;  %vm2813_vm1 = vmmov (!%p565_p9), 0   ;;  %v2279_v24 = vld [vmem:[%s3373_s8] ss:$0 sm:$0xff] (!%p565_p9)  ;;  %vm918_vm2 = vcmask (!%p565_p9), 1043456  }
  0x1a   : > { %2482 = vmatpush3.bf16.msra.mxu0 (!%p565_p9), %v2685_v8  ;;  %2469 = vmatprep.mubr.msk.bf16.mxu1 (!%p565_p9), %vm2813_vm1, %v2812_v9  ;;  %s3418_s29 = sld [smem:[#allocation12_spill]] (!%p565_p9)  ;;  %s3420_s5 = sld [smem:[#allocation16_spill]] (!%p565_p9)  ;;  %v2275_v37 = vld [vmem:[%s3371_s6] ss:$0 sm:$0xff] (!%p565_p9)  ;;  %vm855_vm3 = vcmask (!%p565_p9), 130048   ;;  %vm902_vm4 = vcmask (!%p565_p9), 64512  }
  0x1b   : > { %2483 = vmatprep.subr.bf16.mxu0 (!%p565_p9), %v2812_v9  ;;  %2485 = vmatprep.mubr.msk.bf16.mxu0 (!%p565_p9), %vm2813_vm1, %v2812_v9  ;;  %s3395_s28 = smov (!%p565_p9), 112   ;;  %s3422_s25 = smov (!%p565_p9), 112  }
  0x1c   : > { %s618_s24 = sand.u32 (!%p565_p9), 1, %s2802_s22  }
  0x1d   : > { %s2191_s1 = scalar_lea.sflag (!%p565_p9), [#allocation3], %s618_s24 }
  0x1e   : > { %2484 = vmatpush3.bf16.msra.mxu0 (!%p565_p9), %v2687_v11 }
  0x1f   : > { %s3417_s3 = smov (!%p565_p9), %s3416_s23  ;;  %v2684_v7 = vld [vmem:[%s3416_s23] sm:$0xff] (!%p565_p9)   ;;  %2495 = vmatprep.subr.bf16.mxu0 (!%p565_p9), %v2812_v9  ;;  %s3394_s23 = smov (!%p565_p9), 16  }
  0x20   : > { %s622_s30 = scalar_select %p621_p10, %s2943_s2, 1  ;;  %2466 = vmatpush3.bf16.msra.mxu1 %v2684_v7  ;;  %v2686_v10 = vld [vmem:[%s3417_s3 + $0x8] sm:$0xff]   ;;  %v2269_v16 = vld [vmem:[%s3418_s29] ss:$0 sm:$0xff] }
  0x21   : > { %2467 = vmatprep.subr.bf16.mxu1 %v2812_v9  ;;  %v2688_v21 = vld [vmem:[%s3420_s5] sm:$0xff]   ;;  %v2689_v23 = vld [vmem:[%s3420_s5 + $0x8] sm:$0xff]  }
  0x22   : > { %s2268_s0 = sshll.u32 %s622_s30, 3 }
  0x23   : > { %s624_s27 = scalar_lea.vmem %s3415_s26, %s2268_s0  ;;  %s3419_s0 = sld [smem:[#allocation13_spill]] }
  0x24   : > { %v2975_v0 = vld [vmem:[%s624_s27] sm:$0xff]  ;;  %2468 = vmatpush3.bf16.msra.mxu1 %v2686_v10  ;;  %s3421_s26 = sld [smem:[#allocation15_spill]] }
  0x25   : > { %v630_v1 = vsel %vm629_vm0, %v2975_v0, 0.0  ;;  %2473 = vmatprep.subr.bf16.mxu1 %v2812_v9 }
  0x26   : > { %631 = vadd.xlane.f32.xlu0 %v630_v1 }
  0x29   : > { %v2270_v18 = vld [vmem:[%s3419_s0] ss:$0 sm:$0xff] }
  0x2a   : > { %v2271_v35 = vld [vmem:[%s3421_s26] ss:$0 sm:$0xff] }
  0xb3   : > { %v632_v2 = vpop.xlane.xlu0 %631 }
  0xb4   : > { %v634_v3 = vmul.f32 0.03125, %v632_v2 }
  0xb6   : > { %v635_v4 = vsub.f32 %v2975_v0, %v634_v3 }
  0xb8   : > { %v636_v5 = vmul.f32 %v635_v4, %v635_v4 }
  0xba   : > { %v637_v6 = vsel %vm629_vm0, %v636_v5, 0.0 }
  0xbb   : > { %638 = vadd.xlane.f32.xlu0 %v637_v6 }
 0x148   : > { %v639_v12 = vpop.xlane.xlu0 %638 }
 0x149   : > { %v640_v13 = vmul.f32 0.03125, %v639_v12 }
 0x14b   : > { %v641_v14 = vadd.f32 1e-05, %v640_v13 }
 0x14d   : > { %2722 = vrsqrt.f32 %v641_v14 }
 0x157   : > { %v2723_v15 = vpop.eup %2722 }
 0x158   : > { %v643_v17 = vmul.f32 %v2723_v15, %v635_v4 }
 0x15a   : > { %v650_v19 = vmul.f32 %v2269_v16, %v643_v17 }
 0x15c   : > { %v657_v20 = vadd.f32 %v2270_v18, %v650_v19  ;;  %v2690_v19 = vld [vmem:[%s3374_s9] sm:$0xff]  }
 0x15e   : > { %v658_v22 = vpack.c.bf16 %v657_v20, %v657_v20 }
 0x160   : > { %2470 = vmatmul.mubr.msk.bf16.vlgmr.msra.gmra.mrb[0].mxu1 %vm629_vm0, %v658_v22  ;;  %2486 = vmatmul.mubr.msk.bf16.vlgmr.msra.gmra.mrb[0].mxu0 %vm629_vm0, %v658_v22 }
 0x161   : > { %2474 = vmatpush3.bf16.msra.mxu1 %v2688_v21  ;;  %2477 = vmatprep.mubr.msk.bf16.mxu1 %vm2813_vm1, %v2812_v9 }
 0x162   : > { %2475 = vmatprep.subr.bf16.mxu1 %v2812_v9  ;;  %2497 = vmatprep.mubr.msk.bf16.mxu0 %vm2813_vm1, %v2812_v9 }
 0x165   : > { %2476 = vmatpush3.bf16.msra.mxu1 %v2689_v23 }
 0x166   : > { %2489 = vmatprep.subr.bf16.mxu1 %v2812_v9 }
 0x168   : > { %2478 = vmatmul.mubr.msk.bf16.vlgmr.msra.gmra.mrb[4].mxu1 %vm629_vm0, %v658_v22 }
 0x169   : > { %2491 = vmatprep.mubr.msk.bf16.mxu1 %vm2813_vm1, %v2812_v9 }
 0x233   : > { %v719_v25 = vpop.f32.mrb[0].mxu1  ;;  %v845_v26 = vpop.f32.mrb[0].mxu0 }
 0x234   : > { %v846_v27 = vadd.f32 %v2279_v24, %v845_v26  ;;  %v2471_v28 = vpop.f32.mrb[1].mxu1  ;;  %v2487_v29 = vpop.f32.mrb[1].mxu0  ;;  %v720_v38 = vadd.f32 %v2271_v35, %v719_v25  ;;  %v2691_v24 = vld [vmem:[%s3374_s9 + $0x8] sm:$0xff]  }
 0x235   : > { %v722_v30 = vpop.f32.mrb[2].mxu1  ;;  %v848_v31 = vpop.f32.mrb[2].mxu0 }
 0x236   : > { %v854_v32 = vpack.c.bf16 %v846_v27, %v846_v27  ;;  %v2472_v33 = vpop.f32.mrb[3].mxu1  ;;  %v2488_v34 = vpop.f32.mrb[3].mxu0  ;;  %v851_v43 = vmul.f32 0.25, %v720_v38 }
 0x238   : > { %v920_v36 = vsel %vm918_vm2, %v854_v32, 0  ;;  %v852_v47 = vpack.c.bf16 %v851_v43, %v851_v43 }
 0x239   : > { %2496 = vmatpush3.bf16.msra.mxu0 %v920_v36 }
 0x23a   : > { %2507 = vmatprep.subr.bf16.mxu0 %v2812_v9 }
 0x23b   : > { %v782_v39 = vpop.f32.mrb[4].mxu1 }
 0x23c   : > { %v783_v40 = vadd.f32 %v2275_v37, %v782_v39  ;;  %v2479_v41 = vpop.f32.mrb[5].mxu1 }
 0x23d   : > { %v785_v42 = vpop.f32.mrb[6].mxu1 }
 0x23e   : > { %v853_v44 = vpack.c.bf16 %v783_v40, %v783_v40  ;;  %v2480_v45 = vpop.f32.mrb[7].mxu1 }
 0x23f   : > { %v2692_v45 = vld [vmem:[%s3378_s13] sm:$0xff]  }
 0x240   : > { %v860_v46 = vsel %vm855_vm3, %v853_v44, 0  ;;  %966 = vrot.lane.b32.xlu1 %v853_v44, %s3395_s28 }
 0x241   : > { %2490 = vmatpush3.bf16.xpose.msra.mxu1 %v860_v46  ;;  %v2694_v46 = vld [vmem:[%s3380_s15] sm:$0xff]  }
 0x242   : > { %2501 = vmatprep.subr.bf16.mxu1 %v2812_v9 }
 0x244   : > { %963 = vrot.lane.b32.xlu1 %v852_v47, %s3395_s28 }
 0x248   : > { %2492 = vmatmul.mubr.msk.bf16.vlgmr.msra.gmra.mrb[8].mxu1 %vm855_vm3, %v852_v47  ;;  %v2695_v47 = vld [vmem:[%s3380_s15 + $0x8] sm:$0xff]  }
 0x249   : > { %2503 = vmatprep.mubr.msk.bf16.mxu1 %vm2813_vm1, %v2812_v9 }
 0x2b2   : > { %v967_v48 = vpop.permute.xlu1 %966 }
 0x2b3   : > { %v972_v49 = vsel %vm855_vm3, %v967_v48, 0  ;;  %v2696_v48 = vld [vmem:[%s3380_s15 + $0x10] sm:$0xff]  }
 0x2b4   : > { %2502 = vmatpush3.bf16.xpose.msra.mxu1 %v972_v49  ;;  %v2697_v49 = vld [vmem:[%s3380_s15 + $0x18] sm:$0xff]  }
 0x2b5   : > { %2513 = vmatprep.subr.bf16.mxu1 %v2812_v9 }
 0x2b6   : > { %v964_v50 = vpop.permute.xlu1 %963 }
 0x2bb   : > { %2504 = vmatmul.mubr.msk.bf16.vlgmr.msra.gmra.mrb[12].mxu1 %vm855_vm3, %v964_v50  ;;  %v2698_v50 = vld [vmem:[%s3380_s15 + $0x20] sm:$0xff]  }
 0x2bc   : > { %2517 = vmatprep.mubr.msk.bf16.mxu1 %vm2813_vm1, %v2812_v9  ;;  %2514 = vmatpush3.bf16.msra.mxu1 %v2690_v19 }
 0x2bd   : > { %2515 = vmatprep.subr.bf16.mxu1 %v2812_v9 }
 0x2c0   : > { %2516 = vmatpush3.bf16.msra.mxu1 %v2691_v24  ;;  %v2703_v24 = vld [vmem:[%s3417_s3 + $0x18] sm:$0xff]  }
 0x2c1   : > { %2529 = vmatprep.subr.bf16.mxu1 %v2812_v9 }
 0x31b   : > { %v896_v51 = vpop.f32.mrb[8].mxu1 }
 0x31c   : > { %v2493_v52 = vpop.f32.mrb[9].mxu1  ;;  %v903_v53 = vsel %vm902_vm4, %v896_v51, -inf }
 0x31d   : > { %904 = vmax.xlane.f32.xlu0 %v903_v53  ;;  %v899_v54 = vpop.f32.mrb[10].mxu1 }
 0x31e   : > { %v2494_v55 = vpop.f32.mrb[11].mxu1 }
 0x38e   : > { %v1008_v56 = vpop.f32.mrb[12].mxu1 }
 0x38f   : > { %v2505_v57 = vpop.f32.mrb[13].mxu1  ;;  %v1014_v58 = vsel %vm902_vm4, %v1008_v56, -inf }
 0x390   : > { %1015 = vmax.xlane.f32.xlu1 %v1014_v58  ;;  %v1011_v59 = vpop.f32.mrb[14].mxu1  ;;  %v2292_v58 = vld [vmem:[%s3377_s12] ss:$0 sm:$0xff] }
 0x391   : > { %v2506_v60 = vpop.f32.mrb[15].mxu1 }
 0x3aa   : > { %v905_v61 = vpop.xlane.xlu0 %904 }
 0x3ab   : > { %v906_v62 = vsub.f32 %v896_v51, %v905_v61  ;;  %v2699_v51 = vld [vmem:[%s3380_s15 + $0x28] sm:$0xff]  }
 0x3ad   : > { %v907_v63 = vmul.f32 1.442695, %v906_v62  ;;  %v2700_v62 = vld [vmem:[%s3380_s15 + $0x30] sm:$0xff]  }
 0x3af   : > { %2724 = vpow2.f32 %v907_v63  ;;  %v2701_v63 = vld [vmem:[%s3380_s15 + $0x38] sm:$0xff]  }
 0x3b9   : > { %v2725_v1 = vpop.eup %2724 }
 0x3ba   : > { %v909_v2 = vsel %vm902_vm4, %v2725_v1, 0.0 }
 0x3bb   : > { %910 = vadd.xlane.f32.xlu0 %v909_v2 }
 0x41d   : > { %v1016_v3 = vpop.xlane.xlu1 %1015 }
 0x41e   : > { %v1017_v4 = vsub.f32 %v1008_v56, %v1016_v3  ;;  %v2291_v56 = vld [vmem:[%s3376_s11] ss:$0 sm:$0xff] }
 0x420   : > { %v1018_v5 = vmul.f32 1.442695, %v1017_v4 }
 0x422   : > { %2726 = vpow2.f32 %v1018_v5 }
 0x42c   : > { %v2727_v6 = vpop.eup %2726 }
 0x42d   : > { %v1020_v7 = vsel %vm902_vm4, %v2727_v6, 0.0 }
 0x42e   : > { %1021 = vadd.xlane.f32.xlu0 %v1020_v7 }
 0x444   : > { %1027 = vrot.lane.b32.xlu0 %v854_v32, %s3395_s28  ;;  %v2287_v32 = vld [vmem:[%s3375_s10] ss:$0 sm:$0xff] }
 0x448   : > { %v911_v8 = vpop.xlane.xlu0 %910 }
 0x449   : > { %2728 = vrcp.f32 %v911_v8 }
 0x453   : > { %v2729_v10 = vpop.eup %2728 }
 0x454   : > { %v913_v11 = vmul.f32 %v2729_v10, %v2725_v1  ;;  %v2293_v1 = vld [vmem:[%s3379_s14] ss:$0 sm:$0xff] }
 0x455   : > { %v2297_v10 = vld [vmem:[%s3381_s16] ss:$0 sm:$0xff] }
 0x456   : > { %v914_v12 = vpack.c.bf16 %v913_v11, %v913_v11 }
 0x458   : > { %2498 = vmatmul.mubr.msk.bf16.vlgmr.msra.gmra.mrb[4].mxu0 %vm902_vm4, %v914_v12 }
 0x459   : > { %2509 = vmatprep.mubr.msk.bf16.mxu0 %vm2813_vm1, %v2812_v9 }
 0x4bb   : > { %v1022_v13 = vpop.xlane.xlu0 %1021 }
 0x4bc   : > { %2730 = vrcp.f32 %v1022_v13 }
 0x4bf   : > { %v1028_v14 = vpop.permute.xlu0 %1027 }
 0x4c0   : > { %v1033_v15 = vsel %vm918_vm2, %v1028_v14, 0 }
 0x4c1   : > { %2508 = vmatpush3.bf16.msra.mxu0 %v1033_v15 }
 0x4c2   : > { %2521 = vmatprep.subr.bf16.mxu0 %v2812_v9 }
 0x4c6   : > { %v2731_v16 = vpop.eup %2730 }
 0x4c7   : > { %v1024_v17 = vmul.f32 %v2731_v16, %v2727_v6 }
 0x4c9   : > { %v1025_v18 = vpack.c.bf16 %v1024_v17, %v1024_v17 }
 0x4cb   : > { %2510 = vmatmul.mubr.msk.bf16.vlgmr.msra.gmra.mrb[8].mxu0 %vm902_vm4, %v1025_v18 }
 0x4cc   : > { %2525 = vmatprep.mubr.msk.bf16.mxu0 %vm2813_vm1, %v2812_v9  ;;  %2522 = vmatpush3.bf16.msra.mxu0 %v2692_v45 }
 0x4cd   : > { %2523 = vmatprep.subr.bf16.mxu0 %v2812_v9 }
 0x52b   : > { %v956_v20 = vpop.f32.mrb[4].mxu0 }
 0x52c   : > { %v2499_v21 = vpop.f32.mrb[5].mxu0 }
 0x52d   : > { %v959_v22 = vpop.f32.mrb[6].mxu0 }
 0x52e   : > { %v2500_v23 = vpop.f32.mrb[7].mxu0 }
 0x52f   : > { %v2702_v23 = vld [vmem:[%s3417_s3 + $0x10] sm:$0xff]  }
 0x59e   : > { %v1069_v25 = vpop.f32.mrb[8].mxu0 }
 0x59f   : > { %1076 = vrot.lane.b32.xlu0 %v1069_v25, %s3394_s23  ;;  %v2511_v26 = vpop.f32.mrb[9].mxu0  ;;  %s3423_s23 = smov 16  }
 0x5a0   : > { %v1072_v27 = vpop.f32.mrb[10].mxu0 }
 0x5a1   : > { %v2512_v28 = vpop.f32.mrb[11].mxu0 }
 0x611   : > { %v1077_v29 = vpop.permute.xlu0 %1076 }
 0x612   : > { %v1079_v30 = vsel %vm855_vm3, %v956_v20, %v1077_v29  ;;  %v2308_v29 = vld [vmem:[%s3418_s29 + $0x1] ss:$0 sm:$0xff] }
 0x613   : > { %v1080_v31 = vpack.c.bf16 %v1079_v30, %v1079_v30 }
 0x615   : > { %2518 = vmatmul.mubr.msk.bf16.vlgmr.msra.gmra.mrb[16].mxu1 %vm629_vm0, %v1080_v31  ;;  %v2309_v31 = vld [vmem:[%s3419_s0 + $0x1] ss:$0 sm:$0xff]  ;;  %s2395_s0 = sshll.u32 %s2943_s2, 7  ;;  %s2816_s2 = smov [#allocation2]  }
 0x616   : > { %2545 = vmatprep.mubr.msk.bf16.mxu1 %vm2813_vm1, %v2812_v9  ;;  %2530 = vmatpush3.bf16.msra.mxu1 %v2694_v46  ;;  %s3325_s28 = scalar_lea.hbm %s3385_s20, %s2395_s0 }
 0x617   : > { %2531 = vmatprep.subr.bf16.mxu1 %v2812_v9 }
 0x61a   : > { %2532 = vmatpush3.bf16.msra.mxu1 %v2695_v47 }
 0x61b   : > { %2533 = vmatprep.subr.bf16.mxu1 %v2812_v9 }
 0x61e   : > { %2534 = vmatpush3.bf16.msra.mxu1 %v2696_v48 }
 0x61f   : > { %2535 = vmatprep.subr.bf16.mxu1 %v2812_v9 }
 0x622   : > { %2536 = vmatpush3.bf16.msra.mxu1 %v2697_v49 }
 0x623   : > { %2537 = vmatprep.subr.bf16.mxu1 %v2812_v9 }
 0x626   : > { %2538 = vmatpush3.bf16.msra.mxu1 %v2698_v50 }
 0x627   : > { %2539 = vmatprep.subr.bf16.mxu1 %v2812_v9 }
 0x62a   : > { %2540 = vmatpush3.bf16.msra.mxu1 %v2699_v51 }
 0x62b   : > { %2541 = vmatprep.subr.bf16.mxu1 %v2812_v9 }
 0x62e   : > { %2542 = vmatpush3.bf16.msra.mxu1 %v2700_v62 }
 0x62f   : > { %2543 = vmatprep.subr.bf16.mxu1 %v2812_v9 }
 0x632   : > { %2544 = vmatpush3.bf16.msra.mxu1 %v2701_v63 }
 0x633   : > { %2579 = vmatprep.subr.bf16.mxu1 %v2812_v9 }
 0x6e8   : > { %v1141_v33 = vpop.f32.mrb[16].mxu1 }
 0x6e9   : > { %v1142_v34 = vadd.f32 %v2287_v32, %v1141_v33  ;;  %v2519_v35 = vpop.f32.mrb[17].mxu1 }
 0x6ea   : > { %v1144_v36 = vpop.f32.mrb[18].mxu1 }
 0x6eb   : > { %v3079_v37 = vadd.f32 %v1142_v34, %v2975_v0  ;;  %v2520_v38 = vpop.f32.mrb[19].mxu1  ;;  %v2693_v0 = vld [vmem:[%s3378_s13 + $0x8] sm:$0xff]   ;;  %v2704_v34 = vld [vmem:[%s3420_s5 + $0x10] sm:$0xff]   ;;  %v2705_v36 = vld [vmem:[%s3420_s5 + $0x18] sm:$0xff]  }
 0x6ec   : > { %2524 = vmatpush3.bf16.msra.mxu0 %v2693_v0  ;;  %v2707_v38 = vld [vmem:[%s3372_s7 + $0x18] sm:$0xff]  }
 0x6ed   : > { %v1150_v39 = vsel %vm629_vm0, %v3079_v37, 0.0  ;;  %2549 = vmatprep.subr.bf16.mxu0 %v2812_v9 }
 0x6ee   : > { %1151 = vadd.xlane.f32.xlu1 %v1150_v39 }
 0x77b   : > { %v1152_v40 = vpop.xlane.xlu1 %1151 }
 0x77c   : > { %v1153_v41 = vmul.f32 0.03125, %v1152_v40 }
 0x77e   : > { %v1154_v42 = vsub.f32 %v3079_v37, %v1153_v41 }
 0x780   : > { %v1155_v43 = vmul.f32 %v1154_v42, %v1154_v42 }
 0x782   : > { %v1156_v44 = vsel %vm629_vm0, %v1155_v43, 0.0  ;;  %v2315_v43 = vld [vmem:[%s3421_s26 + $0x1] ss:$0 sm:$0xff] }
 0x783   : > { %1157 = vadd.xlane.f32.xlu0 %v1156_v44  ;;  %v2324_v44 = vld [vmem:[%s3371_s6 + $0x1] ss:$0 sm:$0xff] }
 0x810   : > { %v1158_v52 = vpop.xlane.xlu0 %1157 }
 0x811   : > { %v1159_v53 = vmul.f32 0.03125, %v1158_v52 }
 0x813   : > { %v1160_v54 = vadd.f32 1e-05, %v1159_v53  ;;  %v2333_v53 = vld [vmem:[%s3373_s8 + $0x1] ss:$0 sm:$0xff] }
 0x815   : > { %2732 = vrsqrt.f32 %v1160_v54 }
 0x81f   : > { %v2733_v55 = vpop.eup %2732 }
 0x820   : > { %v1162_v57 = vmul.f32 %v2733_v55, %v1154_v42 }
 0x822   : > { %v1169_v59 = vmul.f32 %v2291_v56, %v1162_v57 }
 0x824   : > { %v1176_v60 = vadd.f32 %v2292_v58, %v1169_v59 }
 0x826   : > { %v1177_v61 = vpack.c.bf16 %v1176_v60, %v1176_v60 }
 0x828   : > { %2526 = vmatmul.mubr.msk.bf16.vlgmr.msra.gmra.mrb[12].mxu0 %vm629_vm0, %v1177_v61 }
 0x829   : > { %2553 = vmatprep.mubr.msk.bf16.mxu0 %vm2813_vm1, %v2812_v9  ;;  %2550 = vmatpush3.bf16.msra.mxu0 %v2702_v23 }
 0x82a   : > { %2551 = vmatprep.subr.bf16.mxu0 %v2812_v9 }
 0x82d   : > { %2552 = vmatpush3.bf16.msra.mxu0 %v2703_v24 }
 0x82e   : > { %2557 = vmatprep.subr.bf16.mxu0 %v2812_v9 }
 0x8fb   : > { %v1238_v2 = vpop.f32.mrb[12].mxu0 }
 0x8fc   : > { %v1239_v3 = vadd.f32 %v2293_v1, %v1238_v2  ;;  %v2527_v4 = vpop.f32.mrb[13].mxu0 }
 0x8fd   : > { %v1241_v5 = vpop.f32.mrb[14].mxu0 }
 0x8fe   : > { %v1244_v6 = vmax.f32 %v1239_v3, 0.0  ;;  %v2528_v7 = vpop.f32.mrb[15].mxu0 }
 0x900   : > { %v1245_v8 = vpack.c.bf16 %v1244_v6, %v1244_v6 }
 0x902   : > { %2546 = vmatmul.mubr.bf16.vlgmr.msra.gmra.mrb[20].mxu1 %v1245_v8 }
 0x903   : > { %2581 = vmatprep.mubr.msk.bf16.mxu1 %vm2813_vm1, %v2812_v9 }
 0x9d5   : > { %v1351_v11 = vpop.f32.mrb[20].mxu1 }
 0x9d6   : > { %v1352_v12 = vadd.f32 %v2297_v10, %v1351_v11  ;;  %v2547_v13 = vpop.f32.mrb[21].mxu1 }
 0x9d7   : > { %v1354_v14 = vpop.f32.mrb[22].mxu1 }
 0x9d8   : > { %v3143_v15 = vadd.f32 %v1352_v12, %v3079_v37  ;;  %v2548_v16 = vpop.f32.mrb[23].mxu1  ;;  %v2706_v37 = vld [vmem:[%s3372_s7 + $0x10] sm:$0xff]  }
 0x9da   : > { %v1362_v17 = vsel %vm629_vm0, %v3143_v15, 0.0 }
 0x9db   : > { %1363 = vadd.xlane.f32.xlu1 %v1362_v17 }
 0xa68   : > { %v1364_v18 = vpop.xlane.xlu1 %1363 }
 0xa69   : > { %v1365_v19 = vmul.f32 0.03125, %v1364_v18 }
 0xa6b   : > { %v1366_v20 = vsub.f32 %v3143_v15, %v1365_v19 }
 0xa6d   : > { %v1367_v21 = vmul.f32 %v1366_v20, %v1366_v20 }
 0xa6f   : > { %v1368_v22 = vsel %vm629_vm0, %v1367_v21, 0.0 }
 0xa70   : > { %1369 = vadd.xlane.f32.xlu1 %v1368_v22 }
 0xafd   : > { %v1370_v25 = vpop.xlane.xlu1 %1369 }
 0xafe   : > { %v1371_v26 = vmul.f32 0.03125, %v1370_v25 }
 0xb00   : > { %v1372_v27 = vadd.f32 1e-05, %v1371_v26 }
 0xb02   : > { %2734 = vrsqrt.f32 %v1372_v27 }
 0xb0c   : > { %v2735_v28 = vpop.eup %2734 }
 0xb0d   : > { %v1374_v30 = vmul.f32 %v2735_v28, %v1366_v20 }
 0xb0f   : > { %v1381_v32 = vmul.f32 %v2308_v29, %v1374_v30 }
 0xb11   : > { %v1388_v33 = vadd.f32 %v2309_v31, %v1381_v32 }
 0xb13   : > { %v1389_v35 = vpack.c.bf16 %v1388_v33, %v1388_v33 }
 0xb15   : > { %2554 = vmatmul.mubr.msk.bf16.vlgmr.msra.gmra.mrb[16].mxu0 %vm629_vm0, %v1389_v35 }
 0xb16   : > { %2558 = vmatpush3.bf16.msra.mxu0 %v2704_v34  ;;  %2561 = vmatprep.mubr.msk.bf16.mxu0 %vm2813_vm1, %v2812_v9  ;;  %v2708_v34 = vld [vmem:[%s3374_s9 + $0x10] sm:$0xff]  }
 0xb17   : > { %2559 = vmatprep.subr.bf16.mxu0 %v2812_v9 }
 0xb1a   : > { %2560 = vmatpush3.bf16.msra.mxu0 %v2705_v36 }
 0xb1b   : > { %2565 = vmatprep.subr.bf16.mxu0 %v2812_v9 }
 0xb1d   : > { %2562 = vmatmul.mubr.msk.bf16.vlgmr.msra.gmra.mrb[20].mxu0 %vm629_vm0, %v1389_v35 }
 0xb1e   : > { %2566 = vmatpush3.bf16.msra.mxu0 %v2706_v37  ;;  %2569 = vmatprep.mubr.msk.bf16.mxu0 %vm2813_vm1, %v2812_v9 }
 0xb1f   : > { %2567 = vmatprep.subr.bf16.mxu0 %v2812_v9 }
 0xb22   : > { %2568 = vmatpush3.bf16.msra.mxu0 %v2707_v38 }
 0xb23   : > { %2573 = vmatprep.subr.bf16.mxu0 %v2812_v9 }
 0xb25   : > { %2570 = vmatmul.mubr.msk.bf16.vlgmr.msra.gmra.mrb[24].mxu0 %vm629_vm0, %v1389_v35 }
 0xb26   : > { %2575 = vmatprep.mubr.msk.bf16.mxu0 %vm2813_vm1, %v2812_v9 }
 0xbe8   : > { %v1452_v39 = vpop.f32.mrb[16].mxu0 }
 0xbe9   : > { %v2555_v40 = vpop.f32.mrb[17].mxu0  ;;  %v1453_v45 = vadd.f32 %v2315_v43, %v1452_v39  ;;  %v2709_v39 = vld [vmem:[%s3374_s9 + $0x18] sm:$0xff]  }
 0xbea   : > { %v1455_v41 = vpop.f32.mrb[18].mxu0 }
 0xbeb   : > { %v2556_v42 = vpop.f32.mrb[19].mxu0  ;;  %v1588_v49 = vmul.f32 0.25, %v1453_v45 }
 0xbed   : > { %v1589_v54 = vpack.c.bf16 %v1588_v49, %v1588_v49 }
 0xbf0   : > { %v1517_v0 = vpop.f32.mrb[20].mxu0 }
 0xbf1   : > { %v1518_v46 = vadd.f32 %v2324_v44, %v1517_v0  ;;  %v2563_v47 = vpop.f32.mrb[21].mxu0 }
 0xbf2   : > { %v1520_v48 = vpop.f32.mrb[22].mxu0 }
 0xbf3   : > { %v1590_v50 = vpack.c.bf16 %v1518_v46, %v1518_v46  ;;  %v2564_v51 = vpop.f32.mrb[23].mxu0  ;;  %v2346_v46 = vld [vmem:[%s3375_s10 + $0x1] ss:$0 sm:$0xff] }
 0xbf5   : > { %v1596_v52 = vsel %vm855_vm3, %v1590_v50, 0  ;;  %1700 = vrot.lane.b32.xlu1 %v1590_v50, %s3422_s25 }
 0xbf6   : > { %2574 = vmatpush3.bf16.xpose.msra.mxu0 %v1596_v52 }
 0xbf7   : > { %2585 = vmatprep.subr.bf16.mxu0 %v2812_v9 }
 0xbf8   : > { %v1582_v55 = vpop.f32.mrb[24].mxu0 }
 0xbf9   : > { %v1583_v56 = vadd.f32 %v2333_v53, %v1582_v55  ;;  %1697 = vrot.lane.b32.xlu1 %v1589_v54, %s3422_s25  ;;  %v2571_v57 = vpop.f32.mrb[25].mxu0 }
 0xbfa   : > { %v1585_v58 = vpop.f32.mrb[26].mxu0 }
 0xbfb   : > { %v1591_v59 = vpack.c.bf16 %v1583_v56, %v1583_v56  ;;  %v2572_v60 = vpop.f32.mrb[27].mxu0 }
 0xbfc   : > { %v2712_v60 = vld [vmem:[%s3380_s15 + $0x40] sm:$0xff]  }
 0xbfd   : > { %v1654_v61 = vsel %vm918_vm2, %v1591_v59, 0  ;;  %2576 = vmatmul.mubr.msk.bf16.vlgmr.msra.gmra.mrb[28].mxu0 %vm855_vm3, %v1589_v54 }
 0xbfe   : > { %2580 = vmatpush3.bf16.msra.mxu1 %v1654_v61  ;;  %2587 = vmatprep.mubr.msk.bf16.mxu0 %vm2813_vm1, %v2812_v9  ;;  %v2713_v61 = vld [vmem:[%s3380_s15 + $0x48] sm:$0xff]  }
 0xbff   : > { %2591 = vmatprep.subr.bf16.mxu1 %v2812_v9 }
 0xc67   : > { %v1701_v62 = vpop.permute.xlu1 %1700 }
 0xc68   : > { %v1706_v63 = vsel %vm855_vm3, %v1701_v62, 0  ;;  %v2714_v62 = vld [vmem:[%s3380_s15 + $0x50] sm:$0xff]  }
 0xc69   : > { %2586 = vmatpush3.bf16.xpose.msra.mxu0 %v1706_v63  ;;  %v2715_v63 = vld [vmem:[%s3380_s15 + $0x58] sm:$0xff]  }
 0xc6a   : > { %2597 = vmatprep.subr.bf16.mxu0 %v2812_v9 }
 0xc6b   : > { %v1698_v1 = vpop.permute.xlu1 %1697 }
 0xc70   : > { %2588 = vmatmul.mubr.msk.bf16.vlgmr.msra.gmra.mrb[32].mxu0 %vm855_vm3, %v1698_v1  ;;  %v2716_v1 = vld [vmem:[%s3380_s15 + $0x60] sm:$0xff]  }
 0xc71   : > { %2601 = vmatprep.mubr.msk.bf16.mxu0 %vm2813_vm1, %v2812_v9  ;;  %2598 = vmatpush3.bf16.msra.mxu0 %v2708_v34 }
 0xc72   : > { %2599 = vmatprep.subr.bf16.mxu0 %v2812_v9 }
 0xc75   : > { %2600 = vmatpush3.bf16.msra.mxu0 %v2709_v39  ;;  %v2721_v39 = vld [vmem:[%s3384_s19 + $0x8] sm:$0xff]  }
 0xc76   : > { %2613 = vmatprep.subr.bf16.mxu0 %v2812_v9 }
 0xcd0   : > { %v1632_v2 = vpop.f32.mrb[28].mxu0 }
 0xcd1   : > { %v2577_v3 = vpop.f32.mrb[29].mxu0  ;;  %v1638_v4 = vsel %vm902_vm4, %v1632_v2, -inf }
 0xcd2   : > { %1639 = vmax.xlane.f32.xlu0 %v1638_v4  ;;  %v1635_v5 = vpop.f32.mrb[30].mxu0 }
 0xcd3   : > { %v2578_v6 = vpop.f32.mrb[31].mxu0 }
 0xd43   : > { %v1742_v7 = vpop.f32.mrb[32].mxu0 }
 0xd44   : > { %v2589_v8 = vpop.f32.mrb[33].mxu0  ;;  %v1748_v10 = vsel %vm902_vm4, %v1742_v7, -inf }
 0xd45   : > { %1749 = vmax.xlane.f32.xlu1 %v1748_v10  ;;  %v1745_v11 = vpop.f32.mrb[34].mxu0  ;;  %v2353_v10 = vld [vmem:[%s3377_s12 + $0x1] ss:$0 sm:$0xff] }
 0xd46   : > { %v2590_v12 = vpop.f32.mrb[35].mxu0 }
 0xd5f   : > { %v1640_v13 = vpop.xlane.xlu0 %1639 }
 0xd60   : > { %v1641_v14 = vsub.f32 %v1632_v2, %v1640_v13  ;;  %v2717_v2 = vld [vmem:[%s3380_s15 + $0x68] sm:$0xff]  }
 0xd62   : > { %v1642_v16 = vmul.f32 1.442695, %v1641_v14  ;;  %v2718_v14 = vld [vmem:[%s3380_s15 + $0x70] sm:$0xff]  }
 0xd64   : > { %2736 = vpow2.f32 %v1642_v16  ;;  %v2719_v16 = vld [vmem:[%s3380_s15 + $0x78] sm:$0xff]  }
 0xd6e   : > { %v2737_v17 = vpop.eup %2736 }
 0xd6f   : > { %v1644_v18 = vsel %vm902_vm4, %v2737_v17, 0.0 }
 0xd70   : > { %1645 = vadd.xlane.f32.xlu0 %v1644_v18 }
 0xdd2   : > { %v1750_v19 = vpop.xlane.xlu1 %1749 }
 0xdd3   : > { %v1751_v20 = vsub.f32 %v1742_v7, %v1750_v19  ;;  %v2352_v7 = vld [vmem:[%s3376_s11 + $0x1] ss:$0 sm:$0xff] }
 0xdd5   : > { %v1752_v21 = vmul.f32 1.442695, %v1751_v20 }
 0xdd7   : > { %2738 = vpow2.f32 %v1752_v21 }
 0xde1   : > { %v2739_v22 = vpop.eup %2738 }
 0xde2   : > { %v1754_v23 = vsel %vm902_vm4, %v2739_v22, 0.0 }
 0xde3   : > { %1755 = vadd.xlane.f32.xlu0 %v1754_v23 }
 0xdf9   : > { %1761 = vrot.lane.b32.xlu0 %v1591_v59, %s3422_s25  ;;  %v2710_v59 = vld [vmem:[%s3378_s13 + $0x10] sm:$0xff]  }
 0xdfd   : > { %v1646_v24 = vpop.xlane.xlu0 %1645 }
 0xdfe   : > { %2740 = vrcp.f32 %v1646_v24 }
 0xe08   : > { %v2741_v25 = vpop.eup %2740 }
 0xe09   : > { %v1648_v26 = vmul.f32 %v2741_v25, %v2737_v17  ;;  %v2359_v17 = vld [vmem:[%s3379_s14 + $0x1] ss:$0 sm:$0xff] }
 0xe0a   : > { %v2380_v25 = vld [vmem:[%s3381_s16 + $0x1] ss:$0 sm:$0xff] }
 0xe0b   : > { %v1649_v27 = vpack.c.bf16 %v1648_v26, %v1648_v26 }
 0xe0d   : > { %2582 = vmatmul.mubr.msk.bf16.vlgmr.msra.gmra.mrb[24].mxu1 %vm902_vm4, %v1649_v27 }
 0xe0e   : > { %2593 = vmatprep.mubr.msk.bf16.mxu1 %vm2813_vm1, %v2812_v9 }
 0xe70   : > { %v1756_v28 = vpop.xlane.xlu0 %1755 }
 0xe71   : > { %2742 = vrcp.f32 %v1756_v28 }
 0xe74   : > { %v1762_v29 = vpop.permute.xlu0 %1761 }
 0xe75   : > { %v1767_v30 = vsel %vm918_vm2, %v1762_v29, 0 }
 0xe76   : > { %2592 = vmatpush3.bf16.msra.mxu1 %v1767_v30 }
 0xe77   : > { %2605 = vmatprep.subr.bf16.mxu1 %v2812_v9 }
 0xe7b   : > { %v2743_v31 = vpop.eup %2742 }
 0xe7c   : > { %v1758_v32 = vmul.f32 %v2743_v31, %v2739_v22 }
 0xe7e   : > { %v1759_v33 = vpack.c.bf16 %v1758_v32, %v1758_v32 }
 0xe80   : > { %2594 = vmatmul.mubr.msk.bf16.vlgmr.msra.gmra.mrb[28].mxu1 %vm902_vm4, %v1759_v33 }
 0xe81   : > { %2609 = vmatprep.mubr.msk.bf16.mxu1 %vm2813_vm1, %v2812_v9  ;;  %2606 = vmatpush3.bf16.msra.mxu1 %v2710_v59 }
 0xe82   : > { %2607 = vmatprep.subr.bf16.mxu1 %v2812_v9 }
 0xee0   : > { %v1690_v35 = vpop.f32.mrb[24].mxu1 }
 0xee1   : > { %v2583_v36 = vpop.f32.mrb[25].mxu1 }
 0xee2   : > { %v1693_v37 = vpop.f32.mrb[26].mxu1 }
 0xee3   : > { %v2584_v38 = vpop.f32.mrb[27].mxu1 }
 0xee4   : > { %v2720_v38 = vld [vmem:[%s3384_s19] sm:$0xff]  }
 0xf53   : > { %v1803_v40 = vpop.f32.mrb[28].mxu1 }
 0xf54   : > { %1810 = vrot.lane.b32.xlu0 %v1803_v40, %s3423_s23  ;;  %v2595_v41 = vpop.f32.mrb[29].mxu1  ;;  %s2267_s23 = sshll.u32 %s618_s24, 3 }
 0xf55   : > { %v1806_v42 = vpop.f32.mrb[30].mxu1  ;;  %s620_s25 = scalar_lea.vmem [#allocation2], %s2267_s23  ;;  %s2752_s23 = sshll.u32 %s2816_s2, 4  ;;  %s2753_s23 = int_to_ptr.vmem [resolvable:$false] %s2752_s23 }
 0xf56   : > { %v2596_v43 = vpop.f32.mrb[31].mxu1  ;;  %s2204_s27 = sshll.u32 %s620_s25, 4  ;;  %s2754_s5 = scalar_lea.vmem %s2753_s23, 256  ;;  %s3320_s27 = int_to_ptr.vmem [resolvable:$true] %s2204_s27 }
 0xf57   : > { %s2748_s3 = scalar_lea.vmem %s3320_s27, 128  ;;  %p2755_p0 = scmp.lt.s32.totalorder %s3320_s27, %s2753_s23 }
 0xf58   : > { %p2749_p11 = scmp.ne.s32.totalorder %s3320_s27, %s2748_s3  ;;  %p2756_p1 = scmp.lt.s32.totalorder %s2754_s5, %s2748_s3 }
 0xf5a   : > { %p2750_p12 = pnand %p2749_p11, %p2960_p5  ;;  %p2757_p2 = por %p2756_p1, %p2755_p0 }
 0xf5c   : > { %p2751_p13 = pneg %p2750_p12 }
 0xf5e   : > { %p2758_p3 = pnand %p2757_p2, %p2751_p13 }
 0xfc6   : > { %v1811_v44 = vpop.permute.xlu0 %1810 }
 0xfc7   : > { %v1813_v45 = vsel %vm855_vm3, %v1690_v35, %v1811_v44  ;;  %v2389_v44 = vld [vmem:[%s3382_s17] ss:$0 sm:$0xff] }
 0xfc8   : > { %v1814_v0 = vpack.c.bf16 %v1813_v45, %v1813_v45 }
 0xfca   : > { %2602 = vmatmul.mubr.msk.bf16.vlgmr.msra.gmra.mrb[36].mxu0 %vm629_vm0, %v1814_v0 }
 0xfcb   : > { %2629 = vmatprep.mubr.msk.bf16.mxu0 %vm2813_vm1, %v2812_v9  ;;  %2614 = vmatpush3.bf16.msra.mxu0 %v2712_v60 }
 0xfcc   : > { %2615 = vmatprep.subr.bf16.mxu0 %v2812_v9 }
 0xfcf   : > { %2616 = vmatpush3.bf16.msra.mxu0 %v2713_v61 }
 0xfd0   : > { %2617 = vmatprep.subr.bf16.mxu0 %v2812_v9 }
 0xfd3   : > { %2618 = vmatpush3.bf16.msra.mxu0 %v2714_v62 }
 0xfd4   : > { %2619 = vmatprep.subr.bf16.mxu0 %v2812_v9 }
 0xfd7   : > { %2620 = vmatpush3.bf16.msra.mxu0 %v2715_v63 }
 0xfd8   : > { %2621 = vmatprep.subr.bf16.mxu0 %v2812_v9 }
 0xfdb   : > { %2622 = vmatpush3.bf16.msra.mxu0 %v2716_v1 }
 0xfdc   : > { %2623 = vmatprep.subr.bf16.mxu0 %v2812_v9 }
 0xfdf   : > { %2624 = vmatpush3.bf16.msra.mxu0 %v2717_v2 }
 0xfe0   : > { %2625 = vmatprep.subr.bf16.mxu0 %v2812_v9 }
 0xfe3   : > { %2626 = vmatpush3.bf16.msra.mxu0 %v2718_v14 }
 0xfe4   : > { %2627 = vmatprep.subr.bf16.mxu0 %v2812_v9 }
 0xfe7   : > { %2628 = vmatpush3.bf16.msra.mxu0 %v2719_v16 }
0x109d   : > { %v1877_v47 = vpop.f32.mrb[36].mxu0 }
0x109e   : > { %v1878_v48 = vadd.f32 %v2346_v46, %v1877_v47  ;;  %v2603_v49 = vpop.f32.mrb[37].mxu0 }
0x109f   : > { %v1880_v50 = vpop.f32.mrb[38].mxu0 }
0x10a0   : > { %v3241_v51 = vadd.f32 %v1878_v48, %v3143_v15  ;;  %v2604_v52 = vpop.f32.mrb[39].mxu0  ;;  %v2711_v15 = vld [vmem:[%s3378_s13 + $0x18] sm:$0xff]  }
0x10a1   : > { %2608 = vmatpush3.bf16.msra.mxu1 %v2711_v15 }
0x10a2   : > { %v1888_v53 = vsel %vm629_vm0, %v3241_v51, 0.0  ;;  %2633 = vmatprep.subr.bf16.mxu1 %v2812_v9 }
0x10a3   : > { %1889 = vadd.xlane.f32.xlu1 %v1888_v53 }
0x1130   : > { %v1890_v54 = vpop.xlane.xlu1 %1889 }
0x1131   : > { %v1891_v55 = vmul.f32 0.03125, %v1890_v54 }
0x1133   : > { %v1892_v56 = vsub.f32 %v3241_v51, %v1891_v55 }
0x1135   : > { %v1893_v57 = vmul.f32 %v1892_v56, %v1892_v56 }
0x1137   : > { %v1894_v58 = vsel %vm629_vm0, %v1893_v57, 0.0 }
0x1138   : > { %1895 = vadd.xlane.f32.xlu0 %v1894_v58 }
0x11c5   : > { %v1896_v3 = vpop.xlane.xlu0 %1895 }
0x11c6   : > { %v1897_v4 = vmul.f32 0.03125, %v1896_v3 }
0x11c8   : > { %v1898_v5 = vadd.f32 1e-05, %v1897_v4 }
0x11ca   : > { %2744 = vrsqrt.f32 %v1898_v5 }
0x11d4   : > { %v2745_v6 = vpop.eup %2744 }
0x11d5   : > { %v1900_v8 = vmul.f32 %v2745_v6, %v1892_v56 }
0x11d7   : > { %v1907_v11 = vmul.f32 %v2352_v7, %v1900_v8 }
0x11d9   : > { %v1914_v12 = vadd.f32 %v2353_v10, %v1907_v11 }
0x11db   : > { %v1915_v13 = vpack.c.bf16 %v1914_v12, %v1914_v12 }
0x11dd   : > { %2610 = vmatmul.mubr.msk.bf16.vlgmr.msra.gmra.mrb[32].mxu1 %vm629_vm0, %v1915_v13 }
0x11de   : > { %2637 = vmatprep.mubr.msk.bf16.mxu1 %vm2813_vm1, %v2812_v9  ;;  %2634 = vmatpush3.bf16.msra.mxu1 %v2720_v38 }
0x11df   : > { %2635 = vmatprep.subr.bf16.mxu1 %v2812_v9  ;;  %v2390_v9 = vld [vmem:[%s3383_s18] ss:$0 sm:$0xff] }
0x11e2   : > { %2636 = vmatpush3.bf16.msra.mxu1 %v2721_v39 }
0x12b0   : > { %v1978_v18 = vpop.f32.mrb[32].mxu1 }
0x12b1   : > { %v1979_v19 = vadd.f32 %v2359_v17, %v1978_v18  ;;  %v2611_v20 = vpop.f32.mrb[33].mxu1 }
0x12b2   : > { %v1981_v21 = vpop.f32.mrb[34].mxu1 }
0x12b3   : > { %v1984_v22 = vmax.f32 %v1979_v19, 0.0  ;;  %v2612_v23 = vpop.f32.mrb[35].mxu1 }
0x12b5   : > { %v1985_v24 = vpack.c.bf16 %v1984_v22, %v1984_v22 }
0x12b7   : > { %2630 = vmatmul.mubr.bf16.vlgmr.msra.gmra.mrb[40].mxu0 %v1985_v24 }
0x138a   : > { %v2093_v26 = vpop.f32.mrb[40].mxu0 }
0x138b   : > { %v2094_v27 = vadd.f32 %v2380_v25, %v2093_v26  ;;  %v2631_v28 = vpop.f32.mrb[41].mxu0 }
0x138c   : > { %v2096_v29 = vpop.f32.mrb[42].mxu0 }
0x138d   : > { %v2632_v30 = vpop.f32.mrb[43].mxu0  ;;  %v2099_v31 = vadd.f32 %v2094_v27, %v3241_v51 }
0x138f   : > { %v2102_v32 = vsel %vm629_vm0, %v2099_v31, 0.0 }
0x1390   : > { %2103 = vadd.xlane.f32.xlu1 %v2102_v32 }
0x141d   : > { %v2104_v33 = vpop.xlane.xlu1 %2103 }
0x141e   : > { %v2105_v34 = vmul.f32 0.03125, %v2104_v33 }
0x1420   : > { %v2106_v35 = vsub.f32 %v2099_v31, %v2105_v34 }
0x1422   : > { %v2107_v36 = vmul.f32 %v2106_v35, %v2106_v35 }
0x1424   : > { %v2108_v37 = vsel %vm629_vm0, %v2107_v36, 0.0 }
0x1425   : > { %2109 = vadd.xlane.f32.xlu1 %v2108_v37 }
0x14b2   : > { %v2110_v40 = vpop.xlane.xlu1 %2109 }
0x14b3   : > { %v2111_v41 = vmul.f32 0.03125, %v2110_v40 }
0x14b5   : > { %v2112_v42 = vadd.f32 1e-05, %v2111_v41 }
0x14b7   : > { %2746 = vrsqrt.f32 %v2112_v42 }
0x14c1   : > { %v2747_v43 = vpop.eup %2746 }
0x14c2   : > { %v2114_v45 = vmul.f32 %v2747_v43, %v2106_v35 }
0x14c4   : > { %v2121_v0 = vmul.f32 %v2389_v44, %v2114_v45 }
0x14c6   : > { %v2128_v46 = vadd.f32 %v2390_v9, %v2121_v0 }
0x14c8   : > { %v2129_v47 = vpack.c.bf16 %v2128_v46, %v2128_v46 }
0x14ca   : > { %2638 = vmatmul.mubr.msk.bf16.vlgmr.msra.gmra.mrb[36].mxu1 %vm629_vm0, %v2129_v47 }
0x159d   : > { %v2183_v48 = vpop.f32.mrb[36].mxu1 }
0x159e   : > { %2189 = vst [vmem:[%s620_s25] sm:$0xff] %v2183_v48  ;;  %v2639_v49 = vpop.f32.mrb[37].mxu1 }
0x159f   : > { %v2186_v50 = vpop.f32.mrb[38].mxu1 }
0x15a0   : > { %2761 = shalt.err (!%p2758_p3)
}
0x15a1   : > { %s2762_s0 = scalar_lea.hbm %s3325_s28, 128  ;;  %s2766_s30 = scalar_lea.hbm %s3385_s20, 256 }
0x15a2   : > { %p2763_p4 = scmp.ne.s32.totalorder %s3325_s28, %s2762_s0  ;;  %p2767_p9 = scmp.lt.u32.totalorder %s3325_s28, %s3385_s20 }
0x15a3   : > { %p2768_p10 = scmp.lt.u32.totalorder %s2766_s30, %s2762_s0  ;;  %p2770_p12 = scmp.lt.u32.totalorder %s2762_s0, %s3325_s28 }
0x15a4   : > { %p2764_p7 = pnand %p2763_p4, %p2960_p5 }
0x15a5   : > { %p2769_p11 = por %p2768_p10, %p2767_p9 }
0x15a6   : > { %p2765_p8 = pneg %p2764_p7 }
0x15a7   : > { %p2771_p13 = por %p2770_p12, %p2769_p11 }
0x15a9   : > { %p2772_p0 = pnand %p2771_p13, %p2765_p8 }
0x15ab   : > { %2775 = shalt.err (!%p2772_p0)
}
0x15ac   : > { %2641 = dma.vmem_to_hbm [thread:$0]  (%p2960_p5), %s3320_s27, 128, %s3325_s28, %s2191_s1   ;;  %v2640_v51 = vpop.f32.mrb[39].mxu1 }
0x15ad PF: > { %s3424_s5 = sld [smem:[#allocation7_spill]]  ;;  %s3425_s3 = sld [smem:[#allocation5_spill]] }
0x15b3   : > { %p2647_p1 = scmp.ge.s32.totalorder %s3424_s5, 2  ;;  %s2216_s24 = sand.u32 1, %s3425_s3  }
0x15b4   : > { %s2217_s25 = scalar_lea.sflag [#allocation3], %s2216_s24 }
0x15b5   : > { %p2644_p2 = pnand %p2647_p1, %p2964_p6 }
0x15b7   : > { %2793 = dma.done.wait (!%p2644_p2), %s2217_s25, 128  }
0x15b8   : > { %2795 = vsyncadd (!%p2644_p2), %s2217_s25, 4294967168  ;;  %s3427_s24 = sld [smem:[#allocation8_spill]]  ;;  %s3428_s0 = sld [smem:[#allocation6_spill]] }
0x15b9   : > { %s3429_s23 = sld [smem:[#allocation9_spill]]  ;;  %s3430_s1 = smov %s2802_s22 }
0x15be   : > { %p30_p3 = scmp.ge.s32.totalorder %s3427_s24, 4   ;;  %s3431_s22 = smov %s3428_s0 }
0x15c0   :  { %32 = sbr.rel (!%p30_p3) target bundleno = 10 (0xa), region = 151 }
0x15c7   :  { %2222 = vsyncpa [#allocation3], 1 }
0x15c8   :  { %2224 = vsyncpa [#allocation3 + $0x1], 1 }

</bundles_post_ra>
